<compile_context>
chip_gen: v5e
topology: v5e:2x2
jax: 0.10.0
libtpu: 0.0.40
codegen_flags: <defaults>
</compile_context>

<pallas_src>
import jax
import jax.numpy as jnp
from jax import lax
from jax.experimental import pallas as pl
from jax.experimental.pallas import tpu as pltpu


_DROP_P = 0.8   # F.dropout default training=True in the reference module


# ----------------------------------------------------------------------------
# One fused kernel: n1 stacked LSTM layers + fc2 + dropout + log_softmax.
#
#   x_ref    : (S*B, H)     embedded input, row index = t*B + b
#   wih_ref  : (n1, H, 4H)  W_ih^T per layer (gate order i, f, g, o)
#   whh_ref  : (n1, H, 4H)  W_hh^T per layer
#   b_ref    : (n1, 1, 4H)  b_ih + b_hh per layer
#   fcw_ref  : (H, n_cat)   fc2 weight^T
#   fcb_ref  : (1, n_cat)   fc2 bias
#   mask_ref : (B, n_cat)   pre-scaled dropout mask (0 or 1/(1-p))
#   o_ref    : (B, n_cat)   output log-probabilities
#   seq_ref  : (S*B, H)     VMEM scratch: previous layer's hidden sequence
# ----------------------------------------------------------------------------
def fused_lstm_kernel(x_ref, wih_ref, whh_ref, b_ref, fcw_ref, fcb_ref,
                      mask_ref, o_ref, seq_ref):
    B, _ = mask_ref.shape
    SB, H = x_ref.shape
    S = SB // B
    n1 = wih_ref.shape[0]

    # Lane mask for gate activations: lanes [2H, 3H) (the "g" gate) use tanh,
    # all other lanes use sigmoid.  Computed once, reused by every step/layer.
    lane = lax.broadcasted_iota(jnp.int32, (B, 4 * H), 1)
    use_tanh = (lane >= 2 * H) & (lane < 3 * H)

    def run_layer(x_all, layer, collect_seq):
        # Hoisted input projection + bias for ALL timesteps: one big MXU
        # matmul (S*B, H) @ (H, 4H) instead of S small ones.
        xp = (jnp.dot(x_all, wih_ref[layer],
                      preferred_element_type=jnp.float32)
              + b_ref[layer])                               # (S*B, 4H)
        whh = whh_ref[layer]                                # (H, 4H)

        h = jnp.zeros((B, H), jnp.float32)
        c = jnp.zeros((B, H), jnp.float32)
        # S is small and static -> fully unrolled time loop (static indices).
        for t in range(S):
            gates = (xp[t * B:(t + 1) * B, :]
                     + jnp.dot(h, whh, preferred_element_type=jnp.float32))
            # Two full-vreg EUP calls blended by lane instead of 4 narrow ones.
            act = jnp.where(use_tanh, jnp.tanh(gates), jax.nn.sigmoid(gates))
            i_g = act[:, 0 * H:1 * H]
            f_g = act[:, 1 * H:2 * H]
            g_g = act[:, 2 * H:3 * H]
            o_g = act[:, 3 * H:4 * H]
            c = f_g * c + i_g * g_g
            h = o_g * jnp.tanh(c)
            if collect_seq:                     # only needed for non-final layers
                seq_ref[t * B:(t + 1) * B, :] = h
        return h

    h_last = None
    for layer in range(n1):
        layer_in = x_ref[...] if layer == 0 else seq_ref[...]
        h_last = run_layer(layer_in, layer, collect_seq=(layer < n1 - 1))

    # Head: fc2 + dropout(p=0.8, training) + numerically-stable log_softmax.
    logits = (jnp.dot(h_last, fcw_ref[...], preferred_element_type=jnp.float32)
              + fcb_ref[...])                               # (B, n_cat)
    dropped = logits * mask_ref[...]
    m = jnp.max(dropped, axis=-1, keepdims=True)
    z = dropped - m
    lse = jnp.log(jnp.sum(jnp.exp(z), axis=-1, keepdims=True))
    o_ref[...] = z - lse


# ----------------------------------------------------------------------------
# Full forward (mirrors LSTM_rnn.forward)
# ----------------------------------------------------------------------------
@jax.jit
def lstm_rnn_forward(inp, params, dropout_key):
    S, B = inp.shape
    H = params["emb"].shape[1]
    n_cat = params["fc_w_t"].shape[1]

    # TODO(synk): embedding gather and dropout-mask RNG are plain-JAX glue;
    # pltpu.prng_* is unavailable under interpret mode and the torch RNG
    # stream is not reproducible anyway (semantics match: keep-prob 1-p,
    # survivors scaled by 1/(1-p)).
    x = jnp.take(params["emb"], inp.reshape(-1), axis=0).astype(jnp.float32)  # (S*B, H)

    keep = jax.random.uniform(dropout_key, (B, n_cat), jnp.float32) >= _DROP_P
    mask = keep.astype(jnp.float32) * (1.0 / (1.0 - _DROP_P))

    wih = jnp.stack(params["wih_t"])     # (n1, H, 4H)
    whh = jnp.stack(params["whh_t"])     # (n1, H, 4H)
    bias = jnp.stack(params["bias"])     # (n1, 1, 4H)

    return pl.pallas_call(
        fused_lstm_kernel,
        out_shape=jax.ShapeDtypeStruct((B, n_cat), jnp.float32),
        in_specs=[pl.BlockSpec(memory_space=pltpu.MemorySpace.VMEM)] * 7,
        out_specs=pl.BlockSpec(memory_space=pltpu.MemorySpace.VMEM),
        scratch_shapes=[pltpu.VMEM((S * B, H), jnp.float32)],   # inter-layer seq
    )(x, wih, whh, bias, params["fc_w_t"], params["fc_b"], mask)


def init_params(key, n_vocab, hidden, n_cat, n1=2):
    ks = jax.random.split(key, 3 + 4 * n1)
    scale = 1.0 / jnp.sqrt(hidden).astype(jnp.float32)
    params = {
        "emb": jax.random.normal(ks[0], (n_vocab, hidden), jnp.float32),
        "fc_w_t": scale * jax.random.normal(ks[1], (hidden, n_cat), jnp.float32),
        "fc_b": scale * jax.random.normal(ks[2], (1, n_cat), jnp.float32),
        "wih_t": [],
        "whh_t": [],
        "bias": [],
    }
    for layer in range(n1):
        k0, k1, k2, k3 = ks[3 + 4 * layer: 3 + 4 * (layer + 1)]
        # PyTorch stores w_ih (4H, in), w_hh (4H, H); we keep them transposed.
        params["wih_t"].append(scale * jax.random.normal(k0, (hidden, 4 * hidden), jnp.float32))
        params["whh_t"].append(scale * jax.random.normal(k1, (hidden, 4 * hidden), jnp.float32))
        b_ih = scale * jax.random.normal(k2, (4 * hidden,), jnp.float32)
        b_hh = scale * jax.random.normal(k3, (4 * hidden,), jnp.float32)
        params["bias"].append((b_ih + b_hh).reshape(1, 4 * hidden))
    return params


if __name__ == "__main__":
    n_vocab, hidden, n_cat, n1 = 50, 32, 8, 2
    seq, batch = 8, 2

    key = jax.random.PRNGKey(0)
    k_param, k_inp, k_drop = jax.random.split(key, 3)

    params = init_params(k_param, n_vocab, hidden, n_cat, n1)
    inp = jax.random.randint(k_inp, (seq, batch), 0, n_vocab, dtype=jnp.int32)

    out = lstm_rnn_forward(inp, params, k_drop)
    out = jax.block_until_ready(out)

    assert out.shape == (batch, n_cat)
    assert bool(jnp.all(jnp.isfinite(out)))
    print("KERNEL_OK")
</pallas_src>

<mosaic_0001>
module attributes {stable_mosaic.version = 11 : i64} {
  func.func @fused_lstm_kernel(%arg0: memref<16x32xf32, #tpu.memory_space<vmem>>, %arg1: memref<2x32x128xf32, #tpu.memory_space<vmem>>, %arg2: memref<2x32x128xf32, #tpu.memory_space<vmem>>, %arg3: memref<2x1x128xf32, #tpu.memory_space<vmem>>, %arg4: memref<32x8xf32, #tpu.memory_space<vmem>>, %arg5: memref<1x8xf32, #tpu.memory_space<vmem>>, %arg6: memref<2x8xf32, #tpu.memory_space<vmem>>, %arg7: memref<2x8xf32, #tpu.memory_space<vmem>>, %arg8: memref<16x32xf32, #tpu.memory_space<vmem>>) attributes {dimension_semantics = [], scalar_prefetch = 0 : i64, scratch_operands = 1 : i64, tpu.core_type = #tpu.core_type<tc>} {
    %0 = tpu.iota {dimensions = array<i32: 1>} : vector<2x128xi32>
    %c64_i32 = arith.constant 64 : i32
    %1 = vector.broadcast %c64_i32 : i32 to vector<2x128xi32>
    %2 = arith.cmpi sge, %0, %1 : vector<2x128xi32>
    %c96_i32 = arith.constant 96 : i32
    %3 = vector.broadcast %c96_i32 : i32 to vector<2x128xi32>
    %4 = arith.cmpi slt, %0, %3 : vector<2x128xi32>
    %5 = arith.andi %2, %4 : vector<2x128xi1>
    %c0 = arith.constant 0 : index
    %c0_0 = arith.constant 0 : index
    %6 = vector.load %arg0[%c0, %c0_0] : memref<16x32xf32, #tpu.memory_space<vmem>>, vector<16x32xf32>
    %c0_1 = arith.constant 0 : index
    %c0_2 = arith.constant 0 : index
    %c0_3 = arith.constant 0 : index
    %7 = vector.load %arg1[%c0_1, %c0_2, %c0_3] : memref<2x32x128xf32, #tpu.memory_space<vmem>>, vector<1x32x128xf32>
    %8 = vector.shape_cast %7 : vector<1x32x128xf32> to vector<32x128xf32>
    %cst = arith.constant dense<0.000000e+00> : vector<16x128xf32>
    %9 = tpu.matmul %6, %8, %cst {dimension_numbers = #tpu.dot_dimension_numbers<[1], [0], [0], [1], [0, 0, 1, 1], [], []>} : vector<16x32xf32>, vector<32x128xf32>, vector<16x128xf32> -> vector<16x128xf32>
    %c0_4 = arith.constant 0 : index
    %c0_5 = arith.constant 0 : index
    %c0_6 = arith.constant 0 : index
    %10 = vector.load %arg3[%c0_4, %c0_5, %c0_6] : memref<2x1x128xf32, #tpu.memory_space<vmem>>, vector<1x1x128xf32>
    %11 = vector.shape_cast %10 : vector<1x1x128xf32> to vector<1x128xf32>
    %12 = vector.broadcast %11 : vector<1x128xf32> to vector<16x128xf32>
    %13 = arith.addf %9, %12 : vector<16x128xf32>
    %c0_7 = arith.constant 0 : index
    %c0_8 = arith.constant 0 : index
    %c0_9 = arith.constant 0 : index
    %14 = vector.load %arg2[%c0_7, %c0_8, %c0_9] : memref<2x32x128xf32, #tpu.memory_space<vmem>>, vector<1x32x128xf32>
    %15 = vector.shape_cast %14 : vector<1x32x128xf32> to vector<32x128xf32>
    %cst_10 = arith.constant 0.000000e+00 : f32
    %16 = vector.broadcast %cst_10 : f32 to vector<2x32xf32>
    %cst_11 = arith.constant 0.000000e+00 : f32
    %17 = vector.broadcast %cst_11 : f32 to vector<2x32xf32>
    %18 = vector.extract_strided_slice %13 {offsets = [0, 0], sizes = [2, 128], strides = [1, 1]} : vector<16x128xf32> to vector<2x128xf32>
    %cst_12 = arith.constant dense<0.000000e+00> : vector<2x128xf32>
    %19 = tpu.matmul %16, %15, %cst_12 {dimension_numbers = #tpu.dot_dimension_numbers<[1], [0], [0], [1], [0, 0, 1, 1], [], []>} : vector<2x32xf32>, vector<32x128xf32>, vector<2x128xf32> -> vector<2x128xf32>
    %20 = arith.addf %18, %19 : vector<2x128xf32>
    %21 = math.tanh %20 : vector<2x128xf32>
    %22 = arith.negf %20 : vector<2x128xf32>
    %23 = math.exp %22 : vector<2x128xf32>
    %cst_13 = arith.constant 1.000000e+00 : f32
    %24 = vector.broadcast %cst_13 : f32 to vector<2x128xf32>
    %25 = arith.addf %24, %23 : vector<2x128xf32>
    %26 = arith.divf %24, %25 : vector<2x128xf32>
    %27 = arith.select %5, %21, %26 : vector<2x128xi1>, vector<2x128xf32>
    %28 = vector.extract_strided_slice %27 {offsets = [0, 0], sizes = [2, 32], strides = [1, 1]} : vector<2x128xf32> to vector<2x32xf32>
    %29 = vector.extract_strided_slice %27 {offsets = [0, 32], sizes = [2, 32], strides = [1, 1]} : vector<2x128xf32> to vector<2x32xf32>
    %30 = vector.extract_strided_slice %27 {offsets = [0, 64], sizes = [2, 32], strides = [1, 1]} : vector<2x128xf32> to vector<2x32xf32>
    %31 = vector.extract_strided_slice %27 {offsets = [0, 96], sizes = [2, 32], strides = [1, 1]} : vector<2x128xf32> to vector<2x32xf32>
    %32 = arith.mulf %29, %17 : vector<2x32xf32>
    %33 = arith.mulf %28, %30 : vector<2x32xf32>
    %34 = arith.addf %32, %33 : vector<2x32xf32>
    %35 = math.tanh %34 : vector<2x32xf32>
    %36 = arith.mulf %31, %35 : vector<2x32xf32>
    %c0_14 = arith.constant 0 : index
    %c0_15 = arith.constant 0 : index
    %37 = vector.load %arg8[%c0_14, %c0_15] : memref<16x32xf32, #tpu.memory_space<vmem>>, vector<2x32xf32>
    tpu.vector_store %arg8[%c0_14, %c0_15], %36 {strides = array<i32>} : memref<16x32xf32, #tpu.memory_space<vmem>>, vector<2x32xf32>,
    %38 = vector.extract_strided_slice %13 {offsets = [2, 0], sizes = [2, 128], strides = [1, 1]} : vector<16x128xf32> to vector<2x128xf32>
    %cst_16 = arith.constant dense<0.000000e+00> : vector<2x128xf32>
    %39 = tpu.matmul %36, %15, %cst_16 {dimension_numbers = #tpu.dot_dimension_numbers<[1], [0], [0], [1], [0, 0, 1, 1], [], []>} : vector<2x32xf32>, vector<32x128xf32>, vector<2x128xf32> -> vector<2x128xf32>
    %40 = arith.addf %38, %39 : vector<2x128xf32>
    %41 = math.tanh %40 : vector<2x128xf32>
    %42 = arith.negf %40 : vector<2x128xf32>
    %43 = math.exp %42 : vector<2x128xf32>
    %cst_17 = arith.constant 1.000000e+00 : f32
    %44 = vector.broadcast %cst_17 : f32 to vector<2x128xf32>
    %45 = arith.addf %44, %43 : vector<2x128xf32>
    %46 = arith.divf %44, %45 : vector<2x128xf32>
    %47 = arith.select %5, %41, %46 : vector<2x128xi1>, vector<2x128xf32>
    %48 = vector.extract_strided_slice %47 {offsets = [0, 0], sizes = [2, 32], strides = [1, 1]} : vector<2x128xf32> to vector<2x32xf32>
    %49 = vector.extract_strided_slice %47 {offsets = [0, 32], sizes = [2, 32], strides = [1, 1]} : vector<2x128xf32> to vector<2x32xf32>
    %50 = vector.extract_strided_slice %47 {offsets = [0, 64], sizes = [2, 32], strides = [1, 1]} : vector<2x128xf32> to vector<2x32xf32>
    %51 = vector.extract_strided_slice %47 {offsets = [0, 96], sizes = [2, 32], strides = [1, 1]} : vector<2x128xf32> to vector<2x32xf32>
    %52 = arith.mulf %49, %34 : vector<2x32xf32>
    %53 = arith.mulf %48, %50 : vector<2x32xf32>
    %54 = arith.addf %52, %53 : vector<2x32xf32>
    %55 = math.tanh %54 : vector<2x32xf32>
    %56 = arith.mulf %51, %55 : vector<2x32xf32>
    %c2 = arith.constant 2 : index
    %c0_18 = arith.constant 0 : index
    %57 = vector.load %arg8[%c2, %c0_18] : memref<16x32xf32, #tpu.memory_space<vmem>>, vector<2x32xf32>
    tpu.vector_store %arg8[%c2, %c0_18], %56 {strides = array<i32>} : memref<16x32xf32, #tpu.memory_space<vmem>>, vector<2x32xf32>,
    %58 = vector.extract_strided_slice %13 {offsets = [4, 0], sizes = [2, 128], strides = [1, 1]} : vector<16x128xf32> to vector<2x128xf32>
    %cst_19 = arith.constant dense<0.000000e+00> : vector<2x128xf32>
    %59 = tpu.matmul %56, %15, %cst_19 {dimension_numbers = #tpu.dot_dimension_numbers<[1], [0], [0], [1], [0, 0, 1, 1], [], []>} : vector<2x32xf32>, vector<32x128xf32>, vector<2x128xf32> -> vector<2x128xf32>
    %60 = arith.addf %58, %59 : vector<2x128xf32>
    %61 = math.tanh %60 : vector<2x128xf32>
    %62 = arith.negf %60 : vector<2x128xf32>
    %63 = math.exp %62 : vector<2x128xf32>
    %cst_20 = arith.constant 1.000000e+00 : f32
    %64 = vector.broadcast %cst_20 : f32 to vector<2x128xf32>
    %65 = arith.addf %64, %63 : vector<2x128xf32>
    %66 = arith.divf %64, %65 : vector<2x128xf32>
    %67 = arith.select %5, %61, %66 : vector<2x128xi1>, vector<2x128xf32>
    %68 = vector.extract_strided_slice %67 {offsets = [0, 0], sizes = [2, 32], strides = [1, 1]} : vector<2x128xf32> to vector<2x32xf32>
    %69 = vector.extract_strided_slice %67 {offsets = [0, 32], sizes = [2, 32], strides = [1, 1]} : vector<2x128xf32> to vector<2x32xf32>
    %70 = vector.extract_strided_slice %67 {offsets = [0, 64], sizes = [2, 32], strides = [1, 1]} : vector<2x128xf32> to vector<2x32xf32>
    %71 = vector.extract_strided_slice %67 {offsets = [0, 96], sizes = [2, 32], strides = [1, 1]} : vector<2x128xf32> to vector<2x32xf32>
    %72 = arith.mulf %69, %54 : vector<2x32xf32>
    %73 = arith.mulf %68, %70 : vector<2x32xf32>
    %74 = arith.addf %72, %73 : vector<2x32xf32>
    %75 = math.tanh %74 : vector<2x32xf32>
    %76 = arith.mulf %71, %75 : vector<2x32xf32>
    %c4 = arith.constant 4 : index
    %c0_21 = arith.constant 0 : index
    %77 = vector.load %arg8[%c4, %c0_21] : memref<16x32xf32, #tpu.memory_space<vmem>>, vector<2x32xf32>
    tpu.vector_store %arg8[%c4, %c0_21], %76 {strides = array<i32>} : memref<16x32xf32, #tpu.memory_space<vmem>>, vector<2x32xf32>,
    %78 = vector.extract_strided_slice %13 {offsets = [6, 0], sizes = [2, 128], strides = [1, 1]} : vector<16x128xf32> to vector<2x128xf32>
    %cst_22 = arith.constant dense<0.000000e+00> : vector<2x128xf32>
    %79 = tpu.matmul %76, %15, %cst_22 {dimension_numbers = #tpu.dot_dimension_numbers<[1], [0], [0], [1], [0, 0, 1, 1], [], []>} : vector<2x32xf32>, vector<32x128xf32>, vector<2x128xf32> -> vector<2x128xf32>
    %80 = arith.addf %78, %79 : vector<2x128xf32>
    %81 = math.tanh %80 : vector<2x128xf32>
    %82 = arith.negf %80 : vector<2x128xf32>
    %83 = math.exp %82 : vector<2x128xf32>
    %cst_23 = arith.constant 1.000000e+00 : f32
    %84 = vector.broadcast %cst_23 : f32 to vector<2x128xf32>
    %85 = arith.addf %84, %83 : vector<2x128xf32>
    %86 = arith.divf %84, %85 : vector<2x128xf32>
    %87 = arith.select %5, %81, %86 : vector<2x128xi1>, vector<2x128xf32>
    %88 = vector.extract_strided_slice %87 {offsets = [0, 0], sizes = [2, 32], strides = [1, 1]} : vector<2x128xf32> to vector<2x32xf32>
    %89 = vector.extract_strided_slice %87 {offsets = [0, 32], sizes = [2, 32], strides = [1, 1]} : vector<2x128xf32> to vector<2x32xf32>
    %90 = vector.extract_strided_slice %87 {offsets = [0, 64], sizes = [2, 32], strides = [1, 1]} : vector<2x128xf32> to vector<2x32xf32>
    %91 = vector.extract_strided_slice %87 {offsets = [0, 96], sizes = [2, 32], strides = [1, 1]} : vector<2x128xf32> to vector<2x32xf32>
    %92 = arith.mulf %89, %74 : vector<2x32xf32>
    %93 = arith.mulf %88, %90 : vector<2x32xf32>
    %94 = arith.addf %92, %93 : vector<2x32xf32>
    %95 = math.tanh %94 : vector<2x32xf32>
    %96 = arith.mulf %91, %95 : vector<2x32xf32>
    %c6 = arith.constant 6 : index
    %c0_24 = arith.constant 0 : index
    %97 = vector.load %arg8[%c6, %c0_24] : memref<16x32xf32, #tpu.memory_space<vmem>>, vector<2x32xf32>
    tpu.vector_store %arg8[%c6, %c0_24], %96 {strides = array<i32>} : memref<16x32xf32, #tpu.memory_space<vmem>>, vector<2x32xf32>,
    %98 = vector.extract_strided_slice %13 {offsets = [8, 0], sizes = [2, 128], strides = [1, 1]} : vector<16x128xf32> to vector<2x128xf32>
    %cst_25 = arith.constant dense<0.000000e+00> : vector<2x128xf32>
    %99 = tpu.matmul %96, %15, %cst_25 {dimension_numbers = #tpu.dot_dimension_numbers<[1], [0], [0], [1], [0, 0, 1, 1], [], []>} : vector<2x32xf32>, vector<32x128xf32>, vector<2x128xf32> -> vector<2x128xf32>
    %100 = arith.addf %98, %99 : vector<2x128xf32>
    %101 = math.tanh %100 : vector<2x128xf32>
    %102 = arith.negf %100 : vector<2x128xf32>
    %103 = math.exp %102 : vector<2x128xf32>
    %cst_26 = arith.constant 1.000000e+00 : f32
    %104 = vector.broadcast %cst_26 : f32 to vector<2x128xf32>
    %105 = arith.addf %104, %103 : vector<2x128xf32>
    %106 = arith.divf %104, %105 : vector<2x128xf32>
    %107 = arith.select %5, %101, %106 : vector<2x128xi1>, vector<2x128xf32>
    %108 = vector.extract_strided_slice %107 {offsets = [0, 0], sizes = [2, 32], strides = [1, 1]} : vector<2x128xf32> to vector<2x32xf32>
    %109 = vector.extract_strided_slice %107 {offsets = [0, 32], sizes = [2, 32], strides = [1, 1]} : vector<2x128xf32> to vector<2x32xf32>
    %110 = vector.extract_strided_slice %107 {offsets = [0, 64], sizes = [2, 32], strides = [1, 1]} : vector<2x128xf32> to vector<2x32xf32>
    %111 = vector.extract_strided_slice %107 {offsets = [0, 96], sizes = [2, 32], strides = [1, 1]} : vector<2x128xf32> to vector<2x32xf32>
    %112 = arith.mulf %109, %94 : vector<2x32xf32>
    %113 = arith.mulf %108, %110 : vector<2x32xf32>
    %114 = arith.addf %112, %113 : vector<2x32xf32>
    %115 = math.tanh %114 : vector<2x32xf32>
    %116 = arith.mulf %111, %115 : vector<2x32xf32>
    %c8 = arith.constant 8 : index
    %c0_27 = arith.constant 0 : index
    %117 = vector.load %arg8[%c8, %c0_27] : memref<16x32xf32, #tpu.memory_space<vmem>>, vector<2x32xf32>
    tpu.vector_store %arg8[%c8, %c0_27], %116 {strides = array<i32>} : memref<16x32xf32, #tpu.memory_space<vmem>>, vector<2x32xf32>,
    %118 = vector.extract_strided_slice %13 {offsets = [10, 0], sizes = [2, 128], strides = [1, 1]} : vector<16x128xf32> to vector<2x128xf32>
    %cst_28 = arith.constant dense<0.000000e+00> : vector<2x128xf32>
    %119 = tpu.matmul %116, %15, %cst_28 {dimension_numbers = #tpu.dot_dimension_numbers<[1], [0], [0], [1], [0, 0, 1, 1], [], []>} : vector<2x32xf32>, vector<32x128xf32>, vector<2x128xf32> -> vector<2x128xf32>
    %120 = arith.addf %118, %119 : vector<2x128xf32>
    %121 = math.tanh %120 : vector<2x128xf32>
    %122 = arith.negf %120 : vector<2x128xf32>
    %123 = math.exp %122 : vector<2x128xf32>
    %cst_29 = arith.constant 1.000000e+00 : f32
    %124 = vector.broadcast %cst_29 : f32 to vector<2x128xf32>
    %125 = arith.addf %124, %123 : vector<2x128xf32>
    %126 = arith.divf %124, %125 : vector<2x128xf32>
    %127 = arith.select %5, %121, %126 : vector<2x128xi1>, vector<2x128xf32>
    %128 = vector.extract_strided_slice %127 {offsets = [0, 0], sizes = [2, 32], strides = [1, 1]} : vector<2x128xf32> to vector<2x32xf32>
    %129 = vector.extract_strided_slice %127 {offsets = [0, 32], sizes = [2, 32], strides = [1, 1]} : vector<2x128xf32> to vector<2x32xf32>
    %130 = vector.extract_strided_slice %127 {offsets = [0, 64], sizes = [2, 32], strides = [1, 1]} : vector<2x128xf32> to vector<2x32xf32>
    %131 = vector.extract_strided_slice %127 {offsets = [0, 96], sizes = [2, 32], strides = [1, 1]} : vector<2x128xf32> to vector<2x32xf32>
    %132 = arith.mulf %129, %114 : vector<2x32xf32>
    %133 = arith.mulf %128, %130 : vector<2x32xf32>
    %134 = arith.addf %132, %133 : vector<2x32xf32>
    %135 = math.tanh %134 : vector<2x32xf32>
    %136 = arith.mulf %131, %135 : vector<2x32xf32>
    %c10 = arith.constant 10 : index
    %c0_30 = arith.constant 0 : index
    %137 = vector.load %arg8[%c10, %c0_30] : memref<16x32xf32, #tpu.memory_space<vmem>>, vector<2x32xf32>
    tpu.vector_store %arg8[%c10, %c0_30], %136 {strides = array<i32>} : memref<16x32xf32, #tpu.memory_space<vmem>>, vector<2x32xf32>,
    %138 = vector.extract_strided_slice %13 {offsets = [12, 0], sizes = [2, 128], strides = [1, 1]} : vector<16x128xf32> to vector<2x128xf32>
    %cst_31 = arith.constant dense<0.000000e+00> : vector<2x128xf32>
    %139 = tpu.matmul %136, %15, %cst_31 {dimension_numbers = #tpu.dot_dimension_numbers<[1], [0], [0], [1], [0, 0, 1, 1], [], []>} : vector<2x32xf32>, vector<32x128xf32>, vector<2x128xf32> -> vector<2x128xf32>
    %140 = arith.addf %138, %139 : vector<2x128xf32>
    %141 = math.tanh %140 : vector<2x128xf32>
    %142 = arith.negf %140 : vector<2x128xf32>
    %143 = math.exp %142 : vector<2x128xf32>
    %cst_32 = arith.constant 1.000000e+00 : f32
    %144 = vector.broadcast %cst_32 : f32 to vector<2x128xf32>
    %145 = arith.addf %144, %143 : vector<2x128xf32>
    %146 = arith.divf %144, %145 : vector<2x128xf32>
    %147 = arith.select %5, %141, %146 : vector<2x128xi1>, vector<2x128xf32>
    %148 = vector.extract_strided_slice %147 {offsets = [0, 0], sizes = [2, 32], strides = [1, 1]} : vector<2x128xf32> to vector<2x32xf32>
    %149 = vector.extract_strided_slice %147 {offsets = [0, 32], sizes = [2, 32], strides = [1, 1]} : vector<2x128xf32> to vector<2x32xf32>
    %150 = vector.extract_strided_slice %147 {offsets = [0, 64], sizes = [2, 32], strides = [1, 1]} : vector<2x128xf32> to vector<2x32xf32>
    %151 = vector.extract_strided_slice %147 {offsets = [0, 96], sizes = [2, 32], strides = [1, 1]} : vector<2x128xf32> to vector<2x32xf32>
    %152 = arith.mulf %149, %134 : vector<2x32xf32>
    %153 = arith.mulf %148, %150 : vector<2x32xf32>
    %154 = arith.addf %152, %153 : vector<2x32xf32>
    %155 = math.tanh %154 : vector<2x32xf32>
    %156 = arith.mulf %151, %155 : vector<2x32xf32>
    %c12 = arith.constant 12 : index
    %c0_33 = arith.constant 0 : index
    %157 = vector.load %arg8[%c12, %c0_33] : memref<16x32xf32, #tpu.memory_space<vmem>>, vector<2x32xf32>
    tpu.vector_store %arg8[%c12, %c0_33], %156 {strides = array<i32>} : memref<16x32xf32, #tpu.memory_space<vmem>>, vector<2x32xf32>,
    %158 = vector.extract_strided_slice %13 {offsets = [14, 0], sizes = [2, 128], strides = [1, 1]} : vector<16x128xf32> to vector<2x128xf32>
    %cst_34 = arith.constant dense<0.000000e+00> : vector<2x128xf32>
    %159 = tpu.matmul %156, %15, %cst_34 {dimension_numbers = #tpu.dot_dimension_numbers<[1], [0], [0], [1], [0, 0, 1, 1], [], []>} : vector<2x32xf32>, vector<32x128xf32>, vector<2x128xf32> -> vector<2x128xf32>
    %160 = arith.addf %158, %159 : vector<2x128xf32>
    %161 = math.tanh %160 : vector<2x128xf32>
    %162 = arith.negf %160 : vector<2x128xf32>
    %163 = math.exp %162 : vector<2x128xf32>
    %cst_35 = arith.constant 1.000000e+00 : f32
    %164 = vector.broadcast %cst_35 : f32 to vector<2x128xf32>
    %165 = arith.addf %164, %163 : vector<2x128xf32>
    %166 = arith.divf %164, %165 : vector<2x128xf32>
    %167 = arith.select %5, %161, %166 : vector<2x128xi1>, vector<2x128xf32>
    %168 = vector.extract_strided_slice %167 {offsets = [0, 0], sizes = [2, 32], strides = [1, 1]} : vector<2x128xf32> to vector<2x32xf32>
    %169 = vector.extract_strided_slice %167 {offsets = [0, 32], sizes = [2, 32], strides = [1, 1]} : vector<2x128xf32> to vector<2x32xf32>
    %170 = vector.extract_strided_slice %167 {offsets = [0, 64], sizes = [2, 32], strides = [1, 1]} : vector<2x128xf32> to vector<2x32xf32>
    %171 = vector.extract_strided_slice %167 {offsets = [0, 96], sizes = [2, 32], strides = [1, 1]} : vector<2x128xf32> to vector<2x32xf32>
    %172 = arith.mulf %169, %154 : vector<2x32xf32>
    %173 = arith.mulf %168, %170 : vector<2x32xf32>
    %174 = arith.addf %172, %173 : vector<2x32xf32>
    %175 = math.tanh %174 : vector<2x32xf32>
    %176 = arith.mulf %171, %175 : vector<2x32xf32>
    %c14 = arith.constant 14 : index
    %c0_36 = arith.constant 0 : index
    %177 = vector.load %arg8[%c14, %c0_36] : memref<16x32xf32, #tpu.memory_space<vmem>>, vector<2x32xf32>
    tpu.vector_store %arg8[%c14, %c0_36], %176 {strides = array<i32>} : memref<16x32xf32, #tpu.memory_space<vmem>>, vector<2x32xf32>,
    %c0_37 = arith.constant 0 : index
    %c0_38 = arith.constant 0 : index
    %178 = vector.load %arg8[%c0_37, %c0_38] : memref<16x32xf32, #tpu.memory_space<vmem>>, vector<16x32xf32>
    %c1 = arith.constant 1 : index
    %c0_39 = arith.constant 0 : index
    %c0_40 = arith.constant 0 : index
    %179 = vector.load %arg1[%c1, %c0_39, %c0_40] : memref<2x32x128xf32, #tpu.memory_space<vmem>>, vector<1x32x128xf32>
    %180 = vector.shape_cast %179 : vector<1x32x128xf32> to vector<32x128xf32>
    %cst_41 = arith.constant dense<0.000000e+00> : vector<16x128xf32>
    %181 = tpu.matmul %178, %180, %cst_41 {dimension_numbers = #tpu.dot_dimension_numbers<[1], [0], [0], [1], [0, 0, 1, 1], [], []>} : vector<16x32xf32>, vector<32x128xf32>, vector<16x128xf32> -> vector<16x128xf32>
    %c1_42 = arith.constant 1 : index
    %c0_43 = arith.constant 0 : index
    %c0_44 = arith.constant 0 : index
    %182 = vector.load %arg3[%c1_42, %c0_43, %c0_44] : memref<2x1x128xf32, #tpu.memory_space<vmem>>, vector<1x1x128xf32>
    %183 = vector.shape_cast %182 : vector<1x1x128xf32> to vector<1x128xf32>
    %184 = vector.broadcast %183 : vector<1x128xf32> to vector<16x128xf32>
    %185 = arith.addf %181, %184 : vector<16x128xf32>
    %c1_45 = arith.constant 1 : index
    %c0_46 = arith.constant 0 : index
    %c0_47 = arith.constant 0 : index
    %186 = vector.load %arg2[%c1_45, %c0_46, %c0_47] : memref<2x32x128xf32, #tpu.memory_space<vmem>>, vector<1x32x128xf32>
    %187 = vector.shape_cast %186 : vector<1x32x128xf32> to vector<32x128xf32>
    %cst_48 = arith.constant 0.000000e+00 : f32
    %188 = vector.broadcast %cst_48 : f32 to vector<2x32xf32>
    %cst_49 = arith.constant 0.000000e+00 : f32
    %189 = vector.broadcast %cst_49 : f32 to vector<2x32xf32>
    %190 = vector.extract_strided_slice %185 {offsets = [0, 0], sizes = [2, 128], strides = [1, 1]} : vector<16x128xf32> to vector<2x128xf32>
    %cst_50 = arith.constant dense<0.000000e+00> : vector<2x128xf32>
    %191 = tpu.matmul %188, %187, %cst_50 {dimension_numbers = #tpu.dot_dimension_numbers<[1], [0], [0], [1], [0, 0, 1, 1], [], []>} : vector<2x32xf32>, vector<32x128xf32>, vector<2x128xf32> -> vector<2x128xf32>
    %192 = arith.addf %190, %191 : vector<2x128xf32>
    %193 = math.tanh %192 : vector<2x128xf32>
    %194 = arith.negf %192 : vector<2x128xf32>
    %195 = math.exp %194 : vector<2x128xf32>
    %cst_51 = arith.constant 1.000000e+00 : f32
    %196 = vector.broadcast %cst_51 : f32 to vector<2x128xf32>
    %197 = arith.addf %196, %195 : vector<2x128xf32>
    %198 = arith.divf %196, %197 : vector<2x128xf32>
    %199 = arith.select %5, %193, %198 : vector<2x128xi1>, vector<2x128xf32>
    %200 = vector.extract_strided_slice %199 {offsets = [0, 0], sizes = [2, 32], strides = [1, 1]} : vector<2x128xf32> to vector<2x32xf32>
    %201 = vector.extract_strided_slice %199 {offsets = [0, 32], sizes = [2, 32], strides = [1, 1]} : vector<2x128xf32> to vector<2x32xf32>
    %202 = vector.extract_strided_slice %199 {offsets = [0, 64], sizes = [2, 32], strides = [1, 1]} : vector<2x128xf32> to vector<2x32xf32>
    %203 = vector.extract_strided_slice %199 {offsets = [0, 96], sizes = [2, 32], strides = [1, 1]} : vector<2x128xf32> to vector<2x32xf32>
    %204 = arith.mulf %201, %189 : vector<2x32xf32>
    %205 = arith.mulf %200, %202 : vector<2x32xf32>
    %206 = arith.addf %204, %205 : vector<2x32xf32>
    %207 = math.tanh %206 : vector<2x32xf32>
    %208 = arith.mulf %203, %207 : vector<2x32xf32>
    %209 = vector.extract_strided_slice %185 {offsets = [2, 0], sizes = [2, 128], strides = [1, 1]} : vector<16x128xf32> to vector<2x128xf32>
    %cst_52 = arith.constant dense<0.000000e+00> : vector<2x128xf32>
    %210 = tpu.matmul %208, %187, %cst_52 {dimension_numbers = #tpu.dot_dimension_numbers<[1], [0], [0], [1], [0, 0, 1, 1], [], []>} : vector<2x32xf32>, vector<32x128xf32>, vector<2x128xf32> -> vector<2x128xf32>
    %211 = arith.addf %209, %210 : vector<2x128xf32>
    %212 = math.tanh %211 : vector<2x128xf32>
    %213 = arith.negf %211 : vector<2x128xf32>
    %214 = math.exp %213 : vector<2x128xf32>
    %cst_53 = arith.constant 1.000000e+00 : f32
    %215 = vector.broadcast %cst_53 : f32 to vector<2x128xf32>
    %216 = arith.addf %215, %214 : vector<2x128xf32>
    %217 = arith.divf %215, %216 : vector<2x128xf32>
    %218 = arith.select %5, %212, %217 : vector<2x128xi1>, vector<2x128xf32>
    %219 = vector.extract_strided_slice %218 {offsets = [0, 0], sizes = [2, 32], strides = [1, 1]} : vector<2x128xf32> to vector<2x32xf32>
    %220 = vector.extract_strided_slice %218 {offsets = [0, 32], sizes = [2, 32], strides = [1, 1]} : vector<2x128xf32> to vector<2x32xf32>
    %221 = vector.extract_strided_slice %218 {offsets = [0, 64], sizes = [2, 32], strides = [1, 1]} : vector<2x128xf32> to vector<2x32xf32>
    %222 = vector.extract_strided_slice %218 {offsets = [0, 96], sizes = [2, 32], strides = [1, 1]} : vector<2x128xf32> to vector<2x32xf32>
    %223 = arith.mulf %220, %206 : vector<2x32xf32>
    %224 = arith.mulf %219, %221 : vector<2x32xf32>
    %225 = arith.addf %223, %224 : vector<2x32xf32>
    %226 = math.tanh %225 : vector<2x32xf32>
    %227 = arith.mulf %222, %226 : vector<2x32xf32>
    %228 = vector.extract_strided_slice %185 {offsets = [4, 0], sizes = [2, 128], strides = [1, 1]} : vector<16x128xf32> to vector<2x128xf32>
    %cst_54 = arith.constant dense<0.000000e+00> : vector<2x128xf32>
    %229 = tpu.matmul %227, %187, %cst_54 {dimension_numbers = #tpu.dot_dimension_numbers<[1], [0], [0], [1], [0, 0, 1, 1], [], []>} : vector<2x32xf32>, vector<32x128xf32>, vector<2x128xf32> -> vector<2x128xf32>
    %230 = arith.addf %228, %229 : vector<2x128xf32>
    %231 = math.tanh %230 : vector<2x128xf32>
    %232 = arith.negf %230 : vector<2x128xf32>
    %233 = math.exp %232 : vector<2x128xf32>
    %cst_55 = arith.constant 1.000000e+00 : f32
    %234 = vector.broadcast %cst_55 : f32 to vector<2x128xf32>
    %235 = arith.addf %234, %233 : vector<2x128xf32>
    %236 = arith.divf %234, %235 : vector<2x128xf32>
    %237 = arith.select %5, %231, %236 : vector<2x128xi1>, vector<2x128xf32>
    %238 = vector.extract_strided_slice %237 {offsets = [0, 0], sizes = [2, 32], strides = [1, 1]} : vector<2x128xf32> to vector<2x32xf32>
    %239 = vector.extract_strided_slice %237 {offsets = [0, 32], sizes = [2, 32], strides = [1, 1]} : vector<2x128xf32> to vector<2x32xf32>
    %240 = vector.extract_strided_slice %237 {offsets = [0, 64], sizes = [2, 32], strides = [1, 1]} : vector<2x128xf32> to vector<2x32xf32>
    %241 = vector.extract_strided_slice %237 {offsets = [0, 96], sizes = [2, 32], strides = [1, 1]} : vector<2x128xf32> to vector<2x32xf32>
    %242 = arith.mulf %239, %225 : vector<2x32xf32>
    %243 = arith.mulf %238, %240 : vector<2x32xf32>
    %244 = arith.addf %242, %243 : vector<2x32xf32>
    %245 = math.tanh %244 : vector<2x32xf32>
    %246 = arith.mulf %241, %245 : vector<2x32xf32>
    %247 = vector.extract_strided_slice %185 {offsets = [6, 0], sizes = [2, 128], strides = [1, 1]} : vector<16x128xf32> to vector<2x128xf32>
    %cst_56 = arith.constant dense<0.000000e+00> : vector<2x128xf32>
    %248 = tpu.matmul %246, %187, %cst_56 {dimension_numbers = #tpu.dot_dimension_numbers<[1], [0], [0], [1], [0, 0, 1, 1], [], []>} : vector<2x32xf32>, vector<32x128xf32>, vector<2x128xf32> -> vector<2x128xf32>
    %249 = arith.addf %247, %248 : vector<2x128xf32>
    %250 = math.tanh %249 : vector<2x128xf32>
    %251 = arith.negf %249 : vector<2x128xf32>
    %252 = math.exp %251 : vector<2x128xf32>
    %cst_57 = arith.constant 1.000000e+00 : f32
    %253 = vector.broadcast %cst_57 : f32 to vector<2x128xf32>
    %254 = arith.addf %253, %252 : vector<2x128xf32>
    %255 = arith.divf %253, %254 : vector<2x128xf32>
    %256 = arith.select %5, %250, %255 : vector<2x128xi1>, vector<2x128xf32>
    %257 = vector.extract_strided_slice %256 {offsets = [0, 0], sizes = [2, 32], strides = [1, 1]} : vector<2x128xf32> to vector<2x32xf32>
    %258 = vector.extract_strided_slice %256 {offsets = [0, 32], sizes = [2, 32], strides = [1, 1]} : vector<2x128xf32> to vector<2x32xf32>
    %259 = vector.extract_strided_slice %256 {offsets = [0, 64], sizes = [2, 32], strides = [1, 1]} : vector<2x128xf32> to vector<2x32xf32>
    %260 = vector.extract_strided_slice %256 {offsets = [0, 96], sizes = [2, 32], strides = [1, 1]} : vector<2x128xf32> to vector<2x32xf32>
    %261 = arith.mulf %258, %244 : vector<2x32xf32>
    %262 = arith.mulf %257, %259 : vector<2x32xf32>
    %263 = arith.addf %261, %262 : vector<2x32xf32>
    %264 = math.tanh %263 : vector<2x32xf32>
    %265 = arith.mulf %260, %264 : vector<2x32xf32>
    %266 = vector.extract_strided_slice %185 {offsets = [8, 0], sizes = [2, 128], strides = [1, 1]} : vector<16x128xf32> to vector<2x128xf32>
    %cst_58 = arith.constant dense<0.000000e+00> : vector<2x128xf32>
    %267 = tpu.matmul %265, %187, %cst_58 {dimension_numbers = #tpu.dot_dimension_numbers<[1], [0], [0], [1], [0, 0, 1, 1], [], []>} : vector<2x32xf32>, vector<32x128xf32>, vector<2x128xf32> -> vector<2x128xf32>
    %268 = arith.addf %266, %267 : vector<2x128xf32>
    %269 = math.tanh %268 : vector<2x128xf32>
    %270 = arith.negf %268 : vector<2x128xf32>
    %271 = math.exp %270 : vector<2x128xf32>
    %cst_59 = arith.constant 1.000000e+00 : f32
    %272 = vector.broadcast %cst_59 : f32 to vector<2x128xf32>
    %273 = arith.addf %272, %271 : vector<2x128xf32>
    %274 = arith.divf %272, %273 : vector<2x128xf32>
    %275 = arith.select %5, %269, %274 : vector<2x128xi1>, vector<2x128xf32>
    %276 = vector.extract_strided_slice %275 {offsets = [0, 0], sizes = [2, 32], strides = [1, 1]} : vector<2x128xf32> to vector<2x32xf32>
    %277 = vector.extract_strided_slice %275 {offsets = [0, 32], sizes = [2, 32], strides = [1, 1]} : vector<2x128xf32> to vector<2x32xf32>
    %278 = vector.extract_strided_slice %275 {offsets = [0, 64], sizes = [2, 32], strides = [1, 1]} : vector<2x128xf32> to vector<2x32xf32>
    %279 = vector.extract_strided_slice %275 {offsets = [0, 96], sizes = [2, 32], strides = [1, 1]} : vector<2x128xf32> to vector<2x32xf32>
    %280 = arith.mulf %277, %263 : vector<2x32xf32>
    %281 = arith.mulf %276, %278 : vector<2x32xf32>
    %282 = arith.addf %280, %281 : vector<2x32xf32>
    %283 = math.tanh %282 : vector<2x32xf32>
    %284 = arith.mulf %279, %283 : vector<2x32xf32>
    %285 = vector.extract_strided_slice %185 {offsets = [10, 0], sizes = [2, 128], strides = [1, 1]} : vector<16x128xf32> to vector<2x128xf32>
    %cst_60 = arith.constant dense<0.000000e+00> : vector<2x128xf32>
    %286 = tpu.matmul %284, %187, %cst_60 {dimension_numbers = #tpu.dot_dimension_numbers<[1], [0], [0], [1], [0, 0, 1, 1], [], []>} : vector<2x32xf32>, vector<32x128xf32>, vector<2x128xf32> -> vector<2x128xf32>
    %287 = arith.addf %285, %286 : vector<2x128xf32>
    %288 = math.tanh %287 : vector<2x128xf32>
    %289 = arith.negf %287 : vector<2x128xf32>
    %290 = math.exp %289 : vector<2x128xf32>
    %cst_61 = arith.constant 1.000000e+00 : f32
    %291 = vector.broadcast %cst_61 : f32 to vector<2x128xf32>
    %292 = arith.addf %291, %290 : vector<2x128xf32>
    %293 = arith.divf %291, %292 : vector<2x128xf32>
    %294 = arith.select %5, %288, %293 : vector<2x128xi1>, vector<2x128xf32>
    %295 = vector.extract_strided_slice %294 {offsets = [0, 0], sizes = [2, 32], strides = [1, 1]} : vector<2x128xf32> to vector<2x32xf32>
    %296 = vector.extract_strided_slice %294 {offsets = [0, 32], sizes = [2, 32], strides = [1, 1]} : vector<2x128xf32> to vector<2x32xf32>
    %297 = vector.extract_strided_slice %294 {offsets = [0, 64], sizes = [2, 32], strides = [1, 1]} : vector<2x128xf32> to vector<2x32xf32>
    %298 = vector.extract_strided_slice %294 {offsets = [0, 96], sizes = [2, 32], strides = [1, 1]} : vector<2x128xf32> to vector<2x32xf32>
    %299 = arith.mulf %296, %282 : vector<2x32xf32>
    %300 = arith.mulf %295, %297 : vector<2x32xf32>
    %301 = arith.addf %299, %300 : vector<2x32xf32>
    %302 = math.tanh %301 : vector<2x32xf32>
    %303 = arith.mulf %298, %302 : vector<2x32xf32>
    %304 = vector.extract_strided_slice %185 {offsets = [12, 0], sizes = [2, 128], strides = [1, 1]} : vector<16x128xf32> to vector<2x128xf32>
    %cst_62 = arith.constant dense<0.000000e+00> : vector<2x128xf32>
    %305 = tpu.matmul %303, %187, %cst_62 {dimension_numbers = #tpu.dot_dimension_numbers<[1], [0], [0], [1], [0, 0, 1, 1], [], []>} : vector<2x32xf32>, vector<32x128xf32>, vector<2x128xf32> -> vector<2x128xf32>
    %306 = arith.addf %304, %305 : vector<2x128xf32>
    %307 = math.tanh %306 : vector<2x128xf32>
    %308 = arith.negf %306 : vector<2x128xf32>
    %309 = math.exp %308 : vector<2x128xf32>
    %cst_63 = arith.constant 1.000000e+00 : f32
    %310 = vector.broadcast %cst_63 : f32 to vector<2x128xf32>
    %311 = arith.addf %310, %309 : vector<2x128xf32>
    %312 = arith.divf %310, %311 : vector<2x128xf32>
    %313 = arith.select %5, %307, %312 : vector<2x128xi1>, vector<2x128xf32>
    %314 = vector.extract_strided_slice %313 {offsets = [0, 0], sizes = [2, 32], strides = [1, 1]} : vector<2x128xf32> to vector<2x32xf32>
    %315 = vector.extract_strided_slice %313 {offsets = [0, 32], sizes = [2, 32], strides = [1, 1]} : vector<2x128xf32> to vector<2x32xf32>
    %316 = vector.extract_strided_slice %313 {offsets = [0, 64], sizes = [2, 32], strides = [1, 1]} : vector<2x128xf32> to vector<2x32xf32>
    %317 = vector.extract_strided_slice %313 {offsets = [0, 96], sizes = [2, 32], strides = [1, 1]} : vector<2x128xf32> to vector<2x32xf32>
    %318 = arith.mulf %315, %301 : vector<2x32xf32>
    %319 = arith.mulf %314, %316 : vector<2x32xf32>
    %320 = arith.addf %318, %319 : vector<2x32xf32>
    %321 = math.tanh %320 : vector<2x32xf32>
    %322 = arith.mulf %317, %321 : vector<2x32xf32>
    %323 = vector.extract_strided_slice %185 {offsets = [14, 0], sizes = [2, 128], strides = [1, 1]} : vector<16x128xf32> to vector<2x128xf32>
    %cst_64 = arith.constant dense<0.000000e+00> : vector<2x128xf32>
    %324 = tpu.matmul %322, %187, %cst_64 {dimension_numbers = #tpu.dot_dimension_numbers<[1], [0], [0], [1], [0, 0, 1, 1], [], []>} : vector<2x32xf32>, vector<32x128xf32>, vector<2x128xf32> -> vector<2x128xf32>
    %325 = arith.addf %323, %324 : vector<2x128xf32>
    %326 = math.tanh %325 : vector<2x128xf32>
    %327 = arith.negf %325 : vector<2x128xf32>
    %328 = math.exp %327 : vector<2x128xf32>
    %cst_65 = arith.constant 1.000000e+00 : f32
    %329 = vector.broadcast %cst_65 : f32 to vector<2x128xf32>
    %330 = arith.addf %329, %328 : vector<2x128xf32>
    %331 = arith.divf %329, %330 : vector<2x128xf32>
    %332 = arith.select %5, %326, %331 : vector<2x128xi1>, vector<2x128xf32>
    %333 = vector.extract_strided_slice %332 {offsets = [0, 0], sizes = [2, 32], strides = [1, 1]} : vector<2x128xf32> to vector<2x32xf32>
    %334 = vector.extract_strided_slice %332 {offsets = [0, 32], sizes = [2, 32], strides = [1, 1]} : vector<2x128xf32> to vector<2x32xf32>
    %335 = vector.extract_strided_slice %332 {offsets = [0, 64], sizes = [2, 32], strides = [1, 1]} : vector<2x128xf32> to vector<2x32xf32>
    %336 = vector.extract_strided_slice %332 {offsets = [0, 96], sizes = [2, 32], strides = [1, 1]} : vector<2x128xf32> to vector<2x32xf32>
    %337 = arith.mulf %334, %320 : vector<2x32xf32>
    %338 = arith.mulf %333, %335 : vector<2x32xf32>
    %339 = arith.addf %337, %338 : vector<2x32xf32>
    %340 = math.tanh %339 : vector<2x32xf32>
    %341 = arith.mulf %336, %340 : vector<2x32xf32>
    %c0_66 = arith.constant 0 : index
    %c0_67 = arith.constant 0 : index
    %342 = vector.load %arg4[%c0_66, %c0_67] : memref<32x8xf32, #tpu.memory_space<vmem>>, vector<32x8xf32>
    %cst_68 = arith.constant dense<0.000000e+00> : vector<2x8xf32>
    %343 = tpu.matmul %341, %342, %cst_68 {dimension_numbers = #tpu.dot_dimension_numbers<[1], [0], [0], [1], [0, 0, 1, 1], [], []>} : vector<2x32xf32>, vector<32x8xf32>, vector<2x8xf32> -> vector<2x8xf32>
    %c0_69 = arith.constant 0 : index
    %c0_70 = arith.constant 0 : index
    %344 = vector.load %arg5[%c0_69, %c0_70] : memref<1x8xf32, #tpu.memory_space<vmem>>, vector<1x8xf32>
    %345 = vector.broadcast %344 : vector<1x8xf32> to vector<2x8xf32>
    %346 = arith.addf %343, %345 : vector<2x8xf32>
    %c0_71 = arith.constant 0 : index
    %c0_72 = arith.constant 0 : index
    %347 = vector.load %arg6[%c0_71, %c0_72] : memref<2x8xf32, #tpu.memory_space<vmem>>, vector<2x8xf32>
    %348 = arith.mulf %346, %347 : vector<2x8xf32>
    %cst_73 = arith.constant dense<0xFF800000> : vector<2xf32>
    %349 = vector.multi_reduction <maximumf>, %348, %cst_73 [1] : vector<2x8xf32> to vector<2xf32>
    %350 = vector.shape_cast %349 : vector<2xf32> to vector<2x1xf32>
    %351 = vector.broadcast %350 : vector<2x1xf32> to vector<2x8xf32>
    %352 = arith.subf %348, %351 : vector<2x8xf32>
    %353 = math.exp %352 : vector<2x8xf32>
    %cst_74 = arith.constant dense<0.000000e+00> : vector<2xf32>
    %354 = vector.multi_reduction <add>, %353, %cst_74 [1] : vector<2x8xf32> to vector<2xf32>
    %355 = vector.shape_cast %354 : vector<2xf32> to vector<2x1xf32>
    %356 = math.log %355 : vector<2x1xf32>
    %357 = vector.broadcast %356 : vector<2x1xf32> to vector<2x8xf32>
    %358 = arith.subf %352, %357 : vector<2x8xf32>
    %c0_75 = arith.constant 0 : index
    %c0_76 = arith.constant 0 : index
    %359 = vector.load %arg7[%c0_75, %c0_76] : memref<2x8xf32, #tpu.memory_space<vmem>>, vector<2x8xf32>
    tpu.vector_store %arg7[%c0_75, %c0_76], %358 {strides = array<i32>} : memref<2x8xf32, #tpu.memory_space<vmem>>, vector<2x8xf32>,
    return
  }
}

</mosaic_0001>

<bundles_post_ra>
// kernel: lstm_rnn_forward.1
= control target key start
LH: loop header
LB: loop body
LE: loop exit
PB: predicated region body
PF: predicated region fallthrough
CT: control target
= control target key end

     0   :  { %s1911_s0 = inlined_call_operand.vmem [shape: f32[16,32], index: 0, kind: input, shape index: {}]   ;;  %s1912_s1 = inlined_call_operand.vmem [shape: f32[2,32,128], index: 1, kind: input, shape index: {}]   ;;  %s1913_s2 = inlined_call_operand.vmem [shape: f32[2,32,128], index: 2, kind: input, shape index: {}]   ;;  %s1914_s3 = inlined_call_operand.vmem [shape: f32[2,1,128], index: 3, kind: input, shape index: {}]   ;;  %s1915_s4 = inlined_call_operand.vmem [shape: f32[32,8], index: 4, kind: input, shape index: {}]   ;;  %s1916_s5 = inlined_call_operand.vmem [shape: f32[1,8], index: 5, kind: input, shape index: {}]   ;;  %s1917_s6 = inlined_call_operand.vmem [shape: f32[2,8], index: 6, kind: input, shape index: {}]   ;;  %s1918_s7 = inlined_call_operand.hbm [shape: f32[2,8], index: 7, kind: output, shape index: {}]  }
   0x1   :  { %v37_v0 = vld [vmem:[%s1912_s1 + $0x18] sm:$0xff]  ;;  %v36_v1 = vld [vmem:[%s1912_s1 + $0x10] sm:$0xff]  ;;  %v35_v4 = vld [vmem:[%s1912_s1 + $0x8] sm:$0xff] }
   0x2   :  { %v75_v2 = vld [vmem:[%s1913_s2 + $0x18] sm:$0xff]  ;;  %61 = vmatpush.msra.mxu0 %v37_v0  ;;  %v74_v3 = vld [vmem:[%s1913_s2 + $0x10] sm:$0xff]  ;;  %v73_v5 = vld [vmem:[%s1913_s2 + $0x8] sm:$0xff] }
   0x3   :  { %91 = vmatpush.msra.mxu1 %v75_v2  ;;  %158 = vmatpush.msra.mxu2 %v75_v2  ;;  %v34_v6 = vld [vmem:[%s1912_s1] sm:$0xff] }
   0x4   :  { %234 = vmatpush.msra.mxu3 %v75_v2  ;;  %62 = vmatpush.msra.mxu0 %v36_v1  ;;  %v72_v7 = vld [vmem:[%s1913_s2] sm:$0xff] }
   0x5   :  { %92 = vmatpush.msra.mxu1 %v74_v3  ;;  %159 = vmatpush.msra.mxu2 %v74_v3 }
   0x6   :  { %235 = vmatpush.msra.mxu3 %v74_v3 }
   0x7   :  { %12 = vsyncpa [#allocation4], 0  ;;  %63 = vmatpush.msra.mxu0 %v35_v4  ;;  %93 = vmatpush.msra.mxu1 %v73_v5  ;;  %v32_v8 = vld [vmem:[%s1911_s0] sm:$0xff]  ;;  %vm42_vm0 = vcmask 261120   ;;  %v1535_v9 = vmov 0.0   ;;  %v27_v18 = vlaneseq  ;;  %s1536_s21 = smov 64  }
   0x8   :  { %160 = vmatpush.msra.mxu2 %v73_v5  ;;  %236 = vmatpush.msra.mxu3 %v73_v5  ;;  %v1611_v10 = vld [vmem:[%s1914_s3] ss:$0 sm:$0xff]  ;;  %s1537_s22 = smov 32   ;;  %vm142_vm8 = vcmask 254976   ;;  %v1262_v26 = vld [vmem:[%s1915_s4 + $0x10] sm:$0xff]  ;;  %s1317_s28 = sshll.u32 %s1918_s7, 4  ;;  %s1318_s28 = int_to_ptr.hbm [resolvable:$true] %s1317_s28 }
   0x9   :  { %64 = vmatpush.msra.mxu0 %v34_v6  ;;  %94 = vmatpush.msra.mxu1 %v72_v7  ;;  %v28_v20 = vand.u32 127, %v27_v18 }
   0xa   :  { %1326 = vmatmul.msk.f32.vlgmr.msra.gmra.mxu0 %vm42_vm0, %v32_v8  ;;  %95 = vmatmul.f32.vlgmr.msra.gmra.mxu1 %v1535_v9 }
   0xb   :  { %161 = vmatpush.msra.mxu2 %v72_v7  ;;  %237 = vmatpush.msra.mxu3 %v72_v7  ;;  %vm29_vm1 = vcmp.ge.s32.totalorder %v28_v20, 64  ;;  %vm30_vm2 = vcmp.lt.s32.totalorder %v28_v20, 96 }
   0xc   :  { %310 = vmatpush.msrb.mxu1 %v75_v2  ;;  %530 = vmatpush.msrb.mxu0 %v75_v2  ;;  %vm1617_vm4 = vmand %vm29_vm1, %vm30_vm2 }
   0xd   :  { %386 = vmatpush.msrb.mxu2 %v75_v2  ;;  %455 = vmatpush.msrb.mxu3 %v75_v2 }
   0xe   :  { %311 = vmatpush.msrb.mxu1 %v74_v3  ;;  %531 = vmatpush.msrb.mxu0 %v74_v3 }
   0xf   :  { %387 = vmatpush.msrb.mxu2 %v74_v3  ;;  %456 = vmatpush.msrb.mxu3 %v74_v3 }
  0x10   :  { %312 = vmatpush.msrb.mxu1 %v73_v5  ;;  %532 = vmatpush.msrb.mxu0 %v73_v5 }
  0x11   :  { %388 = vmatpush.msrb.mxu2 %v73_v5  ;;  %457 = vmatpush.msrb.mxu3 %v73_v5 }
  0x12   :  { %313 = vmatpush.msrb.mxu1 %v72_v7  ;;  %533 = vmatpush.msrb.mxu0 %v72_v7 }
  0x13   :  { %389 = vmatpush.msrb.mxu2 %v72_v7  ;;  %458 = vmatpush.msrb.mxu3 %v72_v7 }
  0x14   :  { %605 = vmatpush.msra.mxu1 %v75_v2 }
  0x16   :  { %606 = vmatpush.msra.mxu1 %v74_v3 }
  0x18   :  { %607 = vmatpush.msra.mxu1 %v73_v5 }
  0x1a   :  { %608 = vmatpush.msra.mxu1 %v72_v7 }
  0x87   :  { %v66_v11 = vpop.f32.mrf.mxu0  ;;  %v96_v12 = vpop.f32.mrf.mxu1 }
  0x88   :  { %v1614_v13 = vadd.f32 %v1611_v10, %v66_v11 }
  0x8a   :  { %v99_v14 = vadd.f32 %v96_v12, %v1614_v13 }
  0x8c   :  { %v1328_v15 = vmul.f32 -1.442695, %v99_v14 }
  0x8e   :  { %1377 = vpow2.f32 %v1328_v15 }
  0x94   :  { %v1378_v16 = vpop.eup %1377 }
  0x95   :  { %v104_v17 = vadd.f32 1.0, %v1378_v16 }
  0x97   :  { %1379 = vrcp.f32 %v104_v17  ;;  %v116_v23 = vand.u32 2147483648, %v104_v17  ;;  %v114_v25 = vand.u32 2147483647, %v104_v17  ;;  %vm110_vm5 = vweird.f32 %v104_v17 }
  0x98   :  { %1381 = vtanh.f32 %v99_v14 }
  0x99   :  { %v117_v28 = vor.u32 1.1754944e-38, %v116_v23  ;;  %vm115_vm7 = vcmp.eq.f32.partialorder %v114_v25, 8.507059e+37 }
  0x9d   :  { %v1380_v19 = vpop.eup %1379 }
  0x9e   :  { %v106_v21 = vmul.f32 %v1380_v19, %v104_v17  ;;  %vm111_vm3 = vweird.f32 %v1380_v19  ;;  %v1382_v30 = vpop.eup %1381 }
  0x9f   :  { %vm112_vm6 = vmor %vm110_vm5, %vm111_vm3 }
  0xa0   :  { %v107_v22 = vsub.f32 1.0, %v106_v21 }
  0xa2   :  { %v108_v24 = vmul.f32 %v1380_v19, %v107_v22 }
  0xa4   :  { %v109_v27 = vadd.f32 %v1380_v19, %v108_v24 }
  0xa6   :  { %v113_v29 = vsel %vm112_vm6, %v1380_v19, %v109_v27 }
  0xa7   :  { %v118_v31 = vsel %vm115_vm7, %v117_v28, %v113_v29 }
  0xa8   :  { %v120_v32 = vsel %vm1617_vm4, %v1382_v30, %v118_v31 }
  0xa9   :  { %123 = vrot.lane.b32.xlu0 %v120_v32, %s1536_s21  ;;  %v121_v35 = vmul.f32 0.0, %v120_v32 }
 0x11b   :  { %v124_v33 = vpop.permute.xlu0 %123 }
 0x11c   :  { %v126_v34 = vmul.f32 %v124_v33, %v120_v32 }
 0x11e   :  { %128 = vrot.lane.b32.xlu0 %v126_v34, %s1537_s22 }
 0x190   :  { %v129_v36 = vpop.permute.xlu0 %128 }
 0x191   :  { %v131_v37 = vadd.f32 %v129_v36, %v121_v35 }
 0x193   :  { %1383 = vtanh.f32 %v131_v37  ;;  %v192_v62 = vrot.slane %v131_v37, 6 }
 0x199   :  { %v1384_v38 = vpop.eup %1383 }
 0x19a   :  { %134 = vrot.lane.b32.xlu1 %v1384_v38, %s1536_s21 }
 0x20c   :  { %v135_v39 = vpop.permute.xlu1 %134 }
 0x20d   :  { %v137_v40 = vmul.f32 %v135_v39, %v120_v32 }
 0x20f   :  { %139 = vrot.lane.b32.xlu1 %v137_v40, %s1537_s22 }
 0x281   :  { %v140_v41 = vpop.permute.xlu1 %139 }
 0x282   :  { %143 = vst.msk [vmem:[#allocation2] sm:$0x3] %vm142_vm8, %v140_v41  ;;  %1329 = vmatmul.msk.f32.vlgmr.msra.gmra.mxu2 %vm42_vm0, %v140_v41 }
 0x305   :  { %v163_v42 = vpop.f32.mrf.mxu2 }
 0x306   :  { %v167_v43 = vrot.slane %v163_v42, 6 }
 0x308   :  { %v169_v44 = vadd.f32 %v167_v43, %v1614_v13 }
 0x30a   :  { %v1330_v45 = vmul.f32 -1.442695, %v169_v44 }
 0x30c   :  { %1385 = vpow2.f32 %v1330_v45 }
 0x312   :  { %v1386_v46 = vpop.eup %1385 }
 0x313   :  { %v174_v47 = vadd.f32 1.0, %v1386_v46 }
 0x315   :  { %1387 = vrcp.f32 %v174_v47  ;;  %v186_v51 = vand.u32 2147483648, %v174_v47  ;;  %v184_v53 = vand.u32 2147483647, %v174_v47  ;;  %vm180_vm10 = vweird.f32 %v174_v47 }
 0x316   :  { %1389 = vtanh.f32 %v169_v44 }
 0x317   :  { %v187_v55 = vor.u32 1.1754944e-38, %v186_v51  ;;  %vm185_vm12 = vcmp.eq.f32.partialorder %v184_v53, 8.507059e+37 }
 0x31b   :  { %v1388_v48 = vpop.eup %1387 }
 0x31c   :  { %v176_v49 = vmul.f32 %v1388_v48, %v174_v47  ;;  %vm181_vm9 = vweird.f32 %v1388_v48  ;;  %v1390_v57 = vpop.eup %1389 }
 0x31d   :  { %vm182_vm11 = vmor %vm180_vm10, %vm181_vm9 }
 0x31e   :  { %v177_v50 = vsub.f32 1.0, %v176_v49 }
 0x320   :  { %v178_v52 = vmul.f32 %v1388_v48, %v177_v50 }
 0x322   :  { %v179_v54 = vadd.f32 %v1388_v48, %v178_v52 }
 0x324   :  { %v183_v56 = vsel %vm182_vm11, %v1388_v48, %v179_v54 }
 0x325   :  { %v188_v58 = vsel %vm185_vm12, %v187_v55, %v183_v56  ;;  %vm215_vm12 = vcmask 257026  }
 0x326   :  { %v190_v59 = vsel %vm1617_vm4, %v1390_v57, %v188_v58 }
 0x327   :  { %196 = vrot.lane.b32.xlu2 %v190_v59, %s1536_s21  ;;  %v194_v63 = vmul.f32 %v192_v62, %v190_v59 }
 0x381   :  { %v197_v60 = vpop.permute.xlu2 %196 }
 0x382   :  { %v199_v61 = vmul.f32 %v197_v60, %v190_v59 }
 0x384   :  { %201 = vrot.lane.b32.xlu2 %v199_v61, %s1537_s22 }
 0x3de   :  { %v202_v0 = vpop.permute.xlu2 %201 }
 0x3df   :  { %v204_v1 = vadd.f32 %v202_v0, %v194_v63 }
 0x3e1   :  { %1391 = vtanh.f32 %v204_v1  ;;  %v268_v31 = vrot.slane %v204_v1, 6 }
 0x3e7   :  { %v1392_v2 = vpop.eup %1391 }
 0x3e8   :  { %207 = vrot.lane.b32.xlu0 %v1392_v2, %s1536_s21 }
 0x45a   :  { %v208_v3 = vpop.permute.xlu0 %207 }
 0x45b   :  { %v1635_v4 = vmul.f32 %v208_v3, %v190_v59  ;;  %v33_v3 = vld [vmem:[%s1911_s0 + $0x8] sm:$0xff] }
 0x45c   :  { %1327 = vmatmul.msk.f32.gmra.mxu0 %vm42_vm0, %v33_v3 }
 0x45d   :  { %v217_v5 = vrot.slane %v1635_v4, 2 }
 0x45f   :  { %218 = vrot.lane.b32.xlu1 %v217_v5, %s1537_s22 }
 0x4d1   :  { %v219_v6 = vpop.permute.xlu1 %218 }
 0x4d2   :  { %1331 = vmatmul.msk.f32.vlgmr.msra.gmra.mxu3 %vm42_vm0, %v219_v6 }
 0x4d9   :  { %v69_v6 = vpop.f32.mrf.mxu0 }
 0x555   :  { %v239_v7 = vpop.f32.mrf.mxu3 }
 0x556   :  { %v243_v8 = vrot.slane %v239_v7, 4  ;;  %v1664_v7 = vadd.f32 %v1611_v10, %v69_v6 }
 0x558   :  { %v245_v11 = vadd.f32 %v243_v8, %v1614_v13 }
 0x55a   :  { %v1332_v12 = vmul.f32 -1.442695, %v245_v11 }
 0x55c   :  { %1393 = vpow2.f32 %v1332_v12 }
 0x562   :  { %v1394_v14 = vpop.eup %1393 }
 0x563   :  { %v250_v15 = vadd.f32 1.0, %v1394_v14 }
 0x565   :  { %1395 = vrcp.f32 %v250_v15  ;;  %v262_v19 = vand.u32 2147483648, %v250_v15  ;;  %v260_v21 = vand.u32 2147483647, %v250_v15  ;;  %vm256_vm14 = vweird.f32 %v250_v15 }
 0x566   :  { %1397 = vtanh.f32 %v245_v11 }
 0x567   :  { %v263_v23 = vor.u32 1.1754944e-38, %v262_v19  ;;  %vm261_vm1 = vcmp.eq.f32.partialorder %v260_v21, 8.507059e+37 }
 0x56b   :  { %v1396_v16 = vpop.eup %1395 }
 0x56c   :  { %v252_v17 = vmul.f32 %v1396_v16, %v250_v15  ;;  %vm257_vm13 = vweird.f32 %v1396_v16  ;;  %v1398_v25 = vpop.eup %1397 }
 0x56d   :  { %vm258_vm15 = vmor %vm256_vm14, %vm257_vm13  ;;  %vm291_vm13 = vcmask 259076   ;;  %vm367_vm14 = vcmask 261126  }
 0x56e   :  { %v253_v18 = vsub.f32 1.0, %v252_v17 }
 0x570   :  { %v254_v20 = vmul.f32 %v1396_v16, %v253_v18 }
 0x572   :  { %v255_v22 = vadd.f32 %v1396_v16, %v254_v20 }
 0x574   :  { %v259_v24 = vsel %vm258_vm15, %v1396_v16, %v255_v22 }
 0x575   :  { %v264_v27 = vsel %vm261_vm1, %v263_v23, %v259_v24 }
 0x576   :  { %v266_v28 = vsel %vm1617_vm4, %v1398_v25, %v264_v27 }
 0x577   :  { %272 = vrot.lane.b32.xlu2 %v266_v28, %s1536_s21  ;;  %v270_v32 = vmul.f32 %v268_v31, %v266_v28 }
 0x5d1   :  { %v273_v29 = vpop.permute.xlu2 %272 }
 0x5d2   :  { %v275_v30 = vmul.f32 %v273_v29, %v266_v28 }
 0x5d4   :  { %277 = vrot.lane.b32.xlu0 %v275_v30, %s1537_s22 }
 0x646   :  { %v278_v33 = vpop.permute.xlu0 %277 }
 0x647   :  { %v280_v34 = vadd.f32 %v278_v33, %v270_v32 }
 0x649   :  { %1399 = vtanh.f32 %v280_v34  ;;  %v344_v59 = vrot.slane %v280_v34, 6 }
 0x64f   :  { %v1400_v35 = vpop.eup %1399 }
 0x650   :  { %283 = vrot.lane.b32.xlu1 %v1400_v35, %s1536_s21 }
 0x6c2   :  { %v284_v36 = vpop.permute.xlu1 %283 }
 0x6c3   :  { %v1646_v37 = vmul.f32 %v284_v36, %v266_v28 }
 0x6c5   :  { %v293_v38 = vrot.slane %v1646_v37, 4 }
 0x6c7   :  { %294 = vrot.lane.b32.xlu2 %v293_v38, %s1537_s22 }
 0x721   :  { %v295_v39 = vpop.permute.xlu2 %294 }
 0x722   :  { %1333 = vmatmul.msk.f32.vlgmr.msrb.gmra.mxu1 %vm42_vm0, %v295_v39  ;;  %v1346_v39 = vld [vmem:[%s1912_s1 + $0x38] sm:$0xff] }
 0x723   :  { %693 = vmatpush.msra.mxu2 %v1346_v39 }
 0x79f   :  { %v315_v40 = vpop.f32.mrf.mxu1 }
 0x7a0   :  { %v319_v41 = vrot.slane %v315_v40, 2  ;;  %v1345_v40 = vld [vmem:[%s1912_s1 + $0x30] sm:$0xff] }
 0x7a1   :  { %694 = vmatpush.msra.mxu2 %v1345_v40 }
 0x7a2   :  { %v321_v42 = vadd.f32 %v319_v41, %v1614_v13  ;;  %v1698_v41 = vld [vmem:[%s1913_s2 + $0x30] sm:$0xff] }
 0x7a4   :  { %v1334_v43 = vmul.f32 -1.442695, %v321_v42 }
 0x7a6   :  { %1401 = vpow2.f32 %v1334_v43  ;;  %v1706_v43 = vld [vmem:[%s1913_s2 + $0x28] sm:$0xff] }
 0x7ac   :  { %v1402_v44 = vpop.eup %1401 }
 0x7ad   :  { %v326_v45 = vadd.f32 1.0, %v1402_v44  ;;  %v1343_v44 = vld [vmem:[%s1912_s1 + $0x20] sm:$0xff] }
 0x7af   :  { %1403 = vrcp.f32 %v326_v45  ;;  %v338_v49 = vand.u32 2147483648, %v326_v45  ;;  %v336_v51 = vand.u32 2147483647, %v326_v45  ;;  %vm332_vm3 = vweird.f32 %v326_v45 }
 0x7b0   :  { %1405 = vtanh.f32 %v321_v42  ;;  %v1344_v42 = vld [vmem:[%s1912_s1 + $0x28] sm:$0xff] }
 0x7b1   :  { %v339_v53 = vor.u32 1.1754944e-38, %v338_v49  ;;  %vm337_vm6 = vcmp.eq.f32.partialorder %v336_v51, 8.507059e+37  ;;  %695 = vmatpush.msra.mxu2 %v1344_v42 }
 0x7b3   :  { %696 = vmatpush.msra.mxu2 %v1343_v44 }
 0x7b5   :  { %v1404_v46 = vpop.eup %1403 }
 0x7b6   :  { %v328_v47 = vmul.f32 %v1404_v46, %v326_v45  ;;  %vm333_vm2 = vweird.f32 %v1404_v46  ;;  %v1406_v13 = vpop.eup %1405  ;;  %v1722_v45 = vld [vmem:[%s1913_s2 + $0x20] sm:$0xff] }
 0x7b7   :  { %vm334_vm5 = vmor %vm332_vm3, %vm333_vm2 }
 0x7b8   :  { %v329_v48 = vsub.f32 1.0, %v328_v47 }
 0x7ba   :  { %v330_v50 = vmul.f32 %v1404_v46, %v329_v48 }
 0x7bc   :  { %v331_v52 = vadd.f32 %v1404_v46, %v330_v50 }
 0x7be   :  { %v335_v54 = vsel %vm334_vm5, %v1404_v46, %v331_v52 }
 0x7bf   :  { %v340_v55 = vsel %vm337_vm6, %v339_v53, %v335_v54 }
 0x7c0   :  { %v342_v56 = vsel %vm1617_vm4, %v1406_v13, %v340_v55 }
 0x7c1   :  { %348 = vrot.lane.b32.xlu0 %v342_v56, %s1536_s21  ;;  %v346_v60 = vmul.f32 %v344_v59, %v342_v56 }
 0x833   :  { %v349_v57 = vpop.permute.xlu0 %348 }
 0x834   :  { %v351_v58 = vmul.f32 %v349_v57, %v342_v56 }
 0x836   :  { %353 = vrot.lane.b32.xlu1 %v351_v58, %s1537_s22 }
 0x8a8   :  { %v354_v61 = vpop.permute.xlu1 %353 }
 0x8a9   :  { %v356_v62 = vadd.f32 %v354_v61, %v346_v60 }
 0x8ab   :  { %1407 = vtanh.f32 %v356_v62  ;;  %v417_v30 = vrot.slane %v356_v62, 6 }
 0x8b1   :  { %v1408_v63 = vpop.eup %1407 }
 0x8b2   :  { %359 = vrot.lane.b32.xlu2 %v1408_v63, %s1536_s21 }
 0x90c   :  { %v360_v0 = vpop.permute.xlu2 %359 }
 0x90d   :  { %v362_v1 = vmul.f32 %v360_v0, %v342_v56 }
 0x90f   :  { %v369_v2 = vrot.slane %v362_v1, 6 }
 0x911   :  { %370 = vrot.lane.b32.xlu0 %v369_v2, %s1537_s22 }
 0x983   :  { %v371_v5 = vpop.permute.xlu0 %370 }
 0x984   :  { %1335 = vmatmul.msk.f32.vlgmr.msrb.gmra.mxu2 %vm42_vm0, %v371_v5 }
 0xa07   :  { %v391_v8 = vpop.f32.mrf.mxu2 }
 0xa08   :  { %v394_v11 = vadd.f32 %v391_v8, %v1664_v7 }
 0xa0a   :  { %v1336_v12 = vmul.f32 -1.442695, %v394_v11 }
 0xa0c   :  { %1409 = vpow2.f32 %v1336_v12 }
 0xa12   :  { %v1410_v14 = vpop.eup %1409 }
 0xa13   :  { %v399_v15 = vadd.f32 1.0, %v1410_v14 }
 0xa15   :  { %1411 = vrcp.f32 %v399_v15  ;;  %v411_v19 = vand.u32 2147483648, %v399_v15  ;;  %v409_v21 = vand.u32 2147483647, %v399_v15  ;;  %vm405_vm9 = vweird.f32 %v399_v15 }
 0xa16   :  { %1413 = vtanh.f32 %v394_v11 }
 0xa17   :  { %v412_v10 = vor.u32 1.1754944e-38, %v411_v19  ;;  %vm410_vm11 = vcmp.eq.f32.partialorder %v409_v21, 8.507059e+37 }
 0xa1b   :  { %v1412_v16 = vpop.eup %1411 }
 0xa1c   :  { %v401_v17 = vmul.f32 %v1412_v16, %v399_v15  ;;  %vm406_vm7 = vweird.f32 %v1412_v16  ;;  %v1414_v24 = vpop.eup %1413 }
 0xa1d   :  { %vm407_vm10 = vmor %vm405_vm9, %vm406_vm7 }
 0xa1e   :  { %v402_v18 = vsub.f32 1.0, %v401_v17 }
 0xa20   :  { %v403_v20 = vmul.f32 %v1412_v16, %v402_v18 }
 0xa22   :  { %v404_v22 = vadd.f32 %v1412_v16, %v403_v20 }
 0xa24   :  { %v408_v23 = vsel %vm407_vm10, %v1412_v16, %v404_v22 }
 0xa25   :  { %v413_v25 = vsel %vm410_vm11, %v412_v10, %v408_v23 }
 0xa26   :  { %v415_v27 = vsel %vm1617_vm4, %v1414_v24, %v413_v25 }
 0xa27   :  { %421 = vrot.lane.b32.xlu1 %v415_v27, %s1536_s21  ;;  %v419_v31 = vmul.f32 %v417_v30, %v415_v27 }
 0xa99   :  { %v422_v28 = vpop.permute.xlu1 %421 }
 0xa9a   :  { %v424_v29 = vmul.f32 %v422_v28, %v415_v27 }
 0xa9c   :  { %426 = vrot.lane.b32.xlu2 %v424_v29, %s1537_s22 }
 0xaa4   :  { %212 = vrot.lane.b32.xlu2 %v1635_v4, %s1537_s22 }
 0xaf6   :  { %v427_v32 = vpop.permute.xlu2 %426 }
 0xaf7   :  { %v1673_v33 = vadd.f32 %v427_v32, %v419_v31 }
 0xaf9   :  { %1415 = vtanh.f32 %v1673_v33  ;;  %v489_v30 = vrot.slane %v1673_v33, 6 }
 0xafe   :  { %v213_v34 = vpop.permute.xlu2 %212 }
 0xaff   :  { %v1416_v35 = vpop.eup %1415  ;;  %216 = vst.msk [vmem:[#allocation2] sm:$0xc] %vm215_vm12, %v213_v34 }
 0xb00   :  { %432 = vrot.lane.b32.xlu0 %v1416_v35, %s1536_s21 }
 0xb08   :  { %288 = vrot.lane.b32.xlu0 %v1646_v37, %s1537_s22  ;;  %v1692_v37 = vld [vmem:[%s1913_s2 + $0x38] sm:$0xff] }
 0xb09   :  { %721 = vmatpush.msra.mxu3 %v1692_v37  ;;  %785 = vmatpush.msra.mxu0 %v1692_v37 }
 0xb0a   :  { %856 = vmatpush.msrb.mxu1 %v1692_v37  ;;  %1136 = vmatpush.msrb.mxu2 %v1692_v37 }
 0xb0b   :  { %722 = vmatpush.msra.mxu3 %v1698_v41  ;;  %786 = vmatpush.msra.mxu0 %v1698_v41 }
 0xb0c   :  { %857 = vmatpush.msrb.mxu1 %v1698_v41  ;;  %1137 = vmatpush.msrb.mxu2 %v1698_v41 }
 0xb0d   :  { %723 = vmatpush.msra.mxu3 %v1706_v43  ;;  %787 = vmatpush.msra.mxu0 %v1706_v43 }
 0xb0e   :  { %858 = vmatpush.msrb.mxu1 %v1706_v43  ;;  %1138 = vmatpush.msrb.mxu2 %v1706_v43 }
 0xb0f   :  { %724 = vmatpush.msra.mxu3 %v1722_v45  ;;  %788 = vmatpush.msra.mxu0 %v1722_v45 }
 0xb10   :  { %859 = vmatpush.msrb.mxu1 %v1722_v45  ;;  %1139 = vmatpush.msrb.mxu2 %v1722_v45 }
 0xb72   :  { %v433_v36 = vpop.permute.xlu0 %432 }
 0xb73   :  { %v435_v38 = vmul.f32 %v433_v36, %v415_v27 }
 0xb75   :  { %437 = vrot.lane.b32.xlu1 %v435_v38, %s1537_s22 }
 0xb7a   :  { %v289_v4 = vpop.permute.xlu0 %288 }
 0xb7b   :  { %292 = vst.msk [vmem:[#allocation2] sm:$0x30] %vm291_vm13, %v289_v4 }
 0xb7d   :  { %364 = vrot.lane.b32.xlu1 %v362_v1, %s1537_s22 }
 0xbe7   :  { %v438_v46 = vpop.permute.xlu1 %437 }
 0xbe8   :  { %440 = vst.msk [vmem:[#allocation2 + $0x8] sm:$0x3] %vm142_vm8, %v438_v46  ;;  %1337 = vmatmul.msk.f32.vlgmr.msrb.gmra.mxu3 %vm42_vm0, %v438_v46 }
 0xbe9   :  { %927 = vmatpush.msrb.mxu3 %v1692_v37 }
 0xbeb   :  { %928 = vmatpush.msrb.mxu3 %v1698_v41 }
 0xbed   :  { %929 = vmatpush.msrb.mxu3 %v1706_v43 }
 0xbef   :  { %v365_v47 = vpop.permute.xlu1 %364  ;;  %930 = vmatpush.msrb.mxu3 %v1722_v45 }
 0xbf0   :  { %368 = vst.msk [vmem:[#allocation2] sm:$0xc0] %vm367_vm14, %v365_v47  ;;  %725 = vmatmul.f32.vlgmr.msra.gmra.mxu3 %v1535_v9  ;;  %v1748_v9 = vld [vmem:[%s1914_s3 + $0x1] ss:$0 sm:$0xff] }
 0xbf1   :  { %1207 = vmatpush.msra.mxu3 %v1692_v37 }
 0xbf3   :  { %1208 = vmatpush.msra.mxu3 %v1698_v41 }
 0xbf5   :  { %1209 = vmatpush.msra.mxu3 %v1706_v43 }
 0xbf7   :  { %v663_v48 = vld [vmem:[#allocation2] sm:$0xff]  ;;  %1210 = vmatpush.msra.mxu3 %v1722_v45 }
 0xbf8   :  { %1348 = vmatmul.msk.f32.vlgmr.msra.gmra.mxu2 %vm42_vm0, %v663_v48 }
 0xc6b   :  { %v460_v49 = vpop.f32.mrf.mxu3 }
 0xc6c   :  { %v464_v50 = vrot.slane %v460_v49, 6 }
 0xc6e   :  { %v466_v51 = vadd.f32 %v464_v50, %v1664_v7 }
 0xc70   :  { %v1338_v52 = vmul.f32 -1.442695, %v466_v51 }
 0xc72   :  { %1417 = vpow2.f32 %v1338_v52 }
 0xc73   :  { %v726_v55 = vpop.f32.mrf.mxu3 }
 0xc78   :  { %v1418_v53 = vpop.eup %1417 }
 0xc79   :  { %v471_v54 = vadd.f32 1.0, %v1418_v53 }
 0xc7b   :  { %1419 = vrcp.f32 %v471_v54  ;;  %v698_v13 = vpop.f32.mrf.mxu2  ;;  %v483_v62 = vand.u32 2147483648, %v471_v54  ;;  %v481_v0 = vand.u32 2147483647, %v471_v54  ;;  %vm477_vm15 = vweird.f32 %v471_v54 }
 0xc7c   :  { %v1751_v56 = vadd.f32 %v1748_v9, %v698_v13 }
 0xc7d   :  { %v484_v5 = vor.u32 1.1754944e-38, %v483_v62  ;;  %vm482_vm2 = vcmp.eq.f32.partialorder %v481_v0, 8.507059e+37 }
 0xc7e   :  { %v729_v57 = vadd.f32 %v726_v55, %v1751_v56 }
 0xc80   :  { %v1354_v58 = vmul.f32 -1.442695, %v729_v57 }
 0xc81   :  { %v1420_v59 = vpop.eup %1419 }
 0xc82   :  { %1421 = vpow2.f32 %v1354_v58  ;;  %v473_v60 = vmul.f32 %v1420_v59, %v471_v54  ;;  %vm478_vm8 = vweird.f32 %v1420_v59 }
 0xc83   :  { %1423 = vtanh.f32 %v466_v51  ;;  %vm479_vm1 = vmor %vm477_vm15, %vm478_vm8 }
 0xc84   :  { %v474_v61 = vsub.f32 1.0, %v473_v60 }
 0xc86   :  { %v475_v63 = vmul.f32 %v1420_v59, %v474_v61 }
 0xc88   :  { %v1422_v1 = vpop.eup %1421  ;;  %v476_v2 = vadd.f32 %v1420_v59, %v475_v63 }
 0xc89   :  { %v734_v3 = vadd.f32 1.0, %v1422_v1  ;;  %v1424_v8 = vpop.eup %1423 }
 0xc8a   :  { %v480_v6 = vsel %vm479_vm1, %v1420_v59, %v476_v2 }
 0xc8b   :  { %1425 = vrcp.f32 %v734_v3  ;;  %v485_v11 = vsel %vm482_vm2, %v484_v5, %v480_v6  ;;  %v746_v17 = vand.u32 2147483648, %v734_v3  ;;  %v744_v19 = vand.u32 2147483647, %v734_v3 }
 0xc8c   :  { %v487_v12 = vsel %vm1617_vm4, %v1424_v8, %v485_v11  ;;  %1427 = vtanh.f32 %v729_v57  ;;  %vm740_vm5 = vweird.f32 %v734_v3 }
 0xc8d   :  { %493 = vrot.lane.b32.xlu2 %v487_v12, %s1536_s21  ;;  %v747_v21 = vor.u32 1.1754944e-38, %v746_v17  ;;  %vm745_vm7 = vcmp.eq.f32.partialorder %v744_v19, 8.507059e+37  ;;  %v491_v31 = vmul.f32 %v489_v30, %v487_v12 }
 0xc91   :  { %v1426_v14 = vpop.eup %1425 }
 0xc92   :  { %v736_v15 = vmul.f32 %v1426_v14, %v734_v3  ;;  %vm741_vm3 = vweird.f32 %v1426_v14  ;;  %v1428_v10 = vpop.eup %1427 }
 0xc93   :  { %vm742_vm6 = vmor %vm740_vm5, %vm741_vm3 }
 0xc94   :  { %v737_v16 = vsub.f32 1.0, %v736_v15 }
 0xc96   :  { %v738_v18 = vmul.f32 %v1426_v14, %v737_v16 }
 0xc98   :  { %v739_v20 = vadd.f32 %v1426_v14, %v738_v18 }
 0xc9a   :  { %v743_v22 = vsel %vm742_vm6, %v1426_v14, %v739_v20 }
 0xc9b   :  { %v748_v23 = vsel %vm745_vm7, %v747_v21, %v743_v22 }
 0xc9c   :  { %v750_v24 = vsel %vm1617_vm4, %v1428_v10, %v748_v23 }
 0xc9d   :  { %753 = vrot.lane.b32.xlu0 %v750_v24, %s1536_s21  ;;  %v751_v36 = vmul.f32 0.0, %v750_v24 }
 0xce7   :  { %v494_v25 = vpop.permute.xlu2 %493 }
 0xce8   :  { %v496_v27 = vmul.f32 %v494_v25, %v487_v12 }
 0xcea   :  { %498 = vrot.lane.b32.xlu1 %v496_v27, %s1537_s22 }
 0xd0f   :  { %v754_v28 = vpop.permute.xlu0 %753 }
 0xd10   :  { %v756_v29 = vmul.f32 %v754_v28, %v750_v24 }
 0xd12   :  { %758 = vrot.lane.b32.xlu2 %v756_v29, %s1537_s22 }
 0xd5c   :  { %v499_v32 = vpop.permute.xlu1 %498 }
 0xd5d   :  { %v1763_v34 = vadd.f32 %v499_v32, %v491_v31 }
 0xd5f   :  { %1429 = vtanh.f32 %v1763_v34  ;;  %v564_v30 = vrot.slane %v1763_v34, 6 }
 0xd65   :  { %v1430_v35 = vpop.eup %1429 }
 0xd66   :  { %504 = vrot.lane.b32.xlu0 %v1430_v35, %s1536_s21 }
 0xd6c   :  { %v759_v38 = vpop.permute.xlu2 %758 }
 0xd6d   :  { %v1767_v4 = vadd.f32 %v759_v38, %v751_v36 }
 0xd6f   :  { %1431 = vtanh.f32 %v1767_v4  ;;  %v819_v38 = vrot.slane %v1767_v4, 6 }
 0xd75   :  { %v1432_v39 = vpop.eup %1431 }
 0xd76   :  { %764 = vrot.lane.b32.xlu1 %v1432_v39, %s1536_s21 }
 0xdd8   :  { %v505_v40 = vpop.permute.xlu0 %504 }
 0xdd9   :  { %v1771_v33 = vmul.f32 %v505_v40, %v487_v12 }
 0xddb   :  { %v513_v42 = vrot.slane %v1771_v33, 2 }
 0xddd   :  { %514 = vrot.lane.b32.xlu2 %v513_v42, %s1537_s22 }
 0xde8   :  { %v765_v44 = vpop.permute.xlu1 %764 }
 0xde9   :  { %v767_v46 = vmul.f32 %v765_v44, %v750_v24 }
 0xdeb   :  { %769 = vrot.lane.b32.xlu0 %v767_v46, %s1537_s22 }
 0xe37   :  { %v515_v47 = vpop.permute.xlu2 %514 }
 0xe38   :  { %1339 = vmatmul.msk.f32.vlgmr.msrb.gmra.mxu0 %vm42_vm0, %v515_v47 }
 0xe39   :  { %998 = vmatpush.msrb.mxu0 %v1692_v37 }
 0xe3b   :  { %999 = vmatpush.msrb.mxu0 %v1698_v41 }
 0xe3d   :  { %1000 = vmatpush.msrb.mxu0 %v1706_v43 }
 0xe3f   :  { %1001 = vmatpush.msrb.mxu0 %v1722_v45 }
 0xe5d   :  { %v770_v48 = vpop.permute.xlu0 %769 }
 0xe5e   :  { %1355 = vmatmul.msk.f32.vlgmr.msra.gmra.mxu0 %vm42_vm0, %v770_v48 }
 0xeb5   :  { %v535_v49 = vpop.f32.mrf.mxu0 }
 0xeb6   :  { %v539_v50 = vrot.slane %v535_v49, 4 }
 0xeb8   :  { %v541_v51 = vadd.f32 %v539_v50, %v1664_v7 }
 0xeba   :  { %v1340_v52 = vmul.f32 -1.442695, %v541_v51 }
 0xebc   :  { %1433 = vpow2.f32 %v1340_v52 }
 0xec2   :  { %v1434_v53 = vpop.eup %1433 }
 0xec3   :  { %v546_v54 = vadd.f32 1.0, %v1434_v53 }
 0xec5   :  { %1435 = vrcp.f32 %v546_v54  ;;  %v558_v58 = vand.u32 2147483648, %v546_v54  ;;  %v556_v60 = vand.u32 2147483647, %v546_v54  ;;  %vm552_vm10 = vweird.f32 %v546_v54 }
 0xec6   :  { %1437 = vtanh.f32 %v541_v51 }
 0xec7   :  { %v559_v62 = vor.u32 1.1754944e-38, %v558_v58  ;;  %vm557_vm8 = vcmp.eq.f32.partialorder %v556_v60, 8.507059e+37 }
 0xecb   :  { %v1436_v13 = vpop.eup %1435 }
 0xecc   :  { %v548_v55 = vmul.f32 %v1436_v13, %v546_v54  ;;  %vm553_vm9 = vweird.f32 %v1436_v13  ;;  %v1438_v0 = vpop.eup %1437 }
 0xecd   :  { %vm554_vm11 = vmor %vm552_vm10, %vm553_vm9 }
 0xece   :  { %v549_v57 = vsub.f32 1.0, %v548_v55 }
 0xed0   :  { %v550_v59 = vmul.f32 %v1436_v13, %v549_v57 }
 0xed2   :  { %v551_v61 = vadd.f32 %v1436_v13, %v550_v59 }
 0xed4   :  { %v555_v63 = vsel %vm554_vm11, %v1436_v13, %v551_v61 }
 0xed5   :  { %v560_v1 = vsel %vm557_vm8, %v559_v62, %v555_v63 }
 0xed6   :  { %v562_v2 = vsel %vm1617_vm4, %v1438_v0, %v560_v1 }
 0xed7   :  { %568 = vrot.lane.b32.xlu1 %v562_v2, %s1536_s21  ;;  %v566_v31 = vmul.f32 %v564_v30, %v562_v2 }
 0xedb   :  { %v790_v3 = vpop.f32.mrf.mxu0 }
 0xedc   :  { %v794_v5 = vrot.slane %v790_v3, 6 }
 0xede   :  { %v796_v6 = vadd.f32 %v794_v5, %v1751_v56 }
 0xee0   :  { %v1356_v8 = vmul.f32 -1.442695, %v796_v6 }
 0xee2   :  { %1439 = vpow2.f32 %v1356_v8 }
 0xee8   :  { %v1440_v11 = vpop.eup %1439 }
 0xee9   :  { %v801_v12 = vadd.f32 1.0, %v1440_v11 }
 0xeeb   :  { %1441 = vrcp.f32 %v801_v12  ;;  %v813_v17 = vand.u32 2147483648, %v801_v12  ;;  %v811_v19 = vand.u32 2147483647, %v801_v12  ;;  %vm807_vm1 = vweird.f32 %v801_v12 }
 0xeec   :  { %1443 = vtanh.f32 %v796_v6 }
 0xeed   :  { %v814_v21 = vor.u32 1.1754944e-38, %v813_v17  ;;  %vm812_vm3 = vcmp.eq.f32.partialorder %v811_v19, 8.507059e+37 }
 0xef1   :  { %v1442_v14 = vpop.eup %1441 }
 0xef2   :  { %v803_v15 = vmul.f32 %v1442_v14, %v801_v12  ;;  %vm808_vm15 = vweird.f32 %v1442_v14  ;;  %v1444_v10 = vpop.eup %1443 }
 0xef3   :  { %vm809_vm2 = vmor %vm807_vm1, %vm808_vm15 }
 0xef4   :  { %v804_v16 = vsub.f32 1.0, %v803_v15 }
 0xef6   :  { %v805_v18 = vmul.f32 %v1442_v14, %v804_v16 }
 0xef8   :  { %v806_v20 = vadd.f32 %v1442_v14, %v805_v18 }
 0xefa   :  { %v810_v22 = vsel %vm809_vm2, %v1442_v14, %v806_v20 }
 0xefb   :  { %v815_v23 = vsel %vm812_vm3, %v814_v21, %v810_v22 }
 0xefc   :  { %v817_v24 = vsel %vm1617_vm4, %v1444_v10, %v815_v23 }
 0xefd   :  { %823 = vrot.lane.b32.xlu2 %v817_v24, %s1536_s21  ;;  %v821_v39 = vmul.f32 %v819_v38, %v817_v24 }
 0xf49   :  { %v569_v25 = vpop.permute.xlu1 %568 }
 0xf4a   :  { %v571_v27 = vmul.f32 %v569_v25, %v562_v2 }
 0xf4c   :  { %573 = vrot.lane.b32.xlu0 %v571_v27, %s1537_s22 }
 0xf57   :  { %v824_v28 = vpop.permute.xlu2 %823 }
 0xf58   :  { %v826_v29 = vmul.f32 %v824_v28, %v817_v24 }
 0xf5a   :  { %828 = vrot.lane.b32.xlu1 %v826_v29, %s1537_s22 }
 0xfbe   :  { %v574_v32 = vpop.permute.xlu0 %573 }
 0xfbf   :  { %v1793_v35 = vadd.f32 %v574_v32, %v566_v31 }
 0xfc1   :  { %1445 = vtanh.f32 %v1793_v35 }
 0xfc7   :  { %v1446_v36 = vpop.eup %1445 }
 0xfc8   :  { %579 = vrot.lane.b32.xlu2 %v1446_v36, %s1536_s21 }
 0xfcc   :  { %v829_v40 = vpop.permute.xlu1 %828 }
 0xfcd   :  { %v1798_v42 = vadd.f32 %v829_v40, %v821_v39 }
 0xfcf   :  { %1447 = vtanh.f32 %v1798_v42  ;;  %v890_v25 = vrot.slane %v1798_v42, 6 }
 0xfd5   :  { %v1448_v44 = vpop.eup %1447 }
 0xfd6   :  { %834 = vrot.lane.b32.xlu0 %v1448_v44, %s1536_s21 }
0x1022   :  { %v580_v34 = vpop.permute.xlu2 %579 }
0x1023   :  { %v1802_v46 = vmul.f32 %v580_v34, %v562_v2 }
0x1025   :  { %v588_v47 = vrot.slane %v1802_v46, 4 }
0x1027   :  { %589 = vrot.lane.b32.xlu1 %v588_v47, %s1537_s22 }
0x1048   :  { %v835_v48 = vpop.permute.xlu0 %834 }
0x1049   :  { %v837_v49 = vmul.f32 %v835_v48, %v817_v24 }
0x104b   :  { %v839_v50 = vrot.slane %v837_v49, 2 }
0x104d   :  { %840 = vrot.lane.b32.xlu2 %v839_v50, %s1537_s22 }
0x1099   :  { %v590_v4 = vpop.permute.xlu1 %589 }
0x109a   :  { %1341 = vmatmul.msk.f32.vlgmr.msra.gmra.mxu1 %vm42_vm0, %v590_v4 }
0x109b   :  { %1065 = vmatpush.msra.mxu1 %v1692_v37 }
0x109d   :  { %1066 = vmatpush.msra.mxu1 %v1698_v41 }
0x109f   :  { %1067 = vmatpush.msra.mxu1 %v1706_v43 }
0x10a1   :  { %1068 = vmatpush.msra.mxu1 %v1722_v45 }
0x10a7   :  { %v841_v51 = vpop.permute.xlu2 %840 }
0x10a8   :  { %1357 = vmatmul.msk.f32.vlgmr.msrb.gmra.mxu1 %vm42_vm0, %v841_v51 }
0x1117   :  { %v610_v52 = vpop.f32.mrf.mxu1 }
0x1118   :  { %v614_v3 = vrot.slane %v610_v52, 2 }
0x111a   :  { %v616_v5 = vadd.f32 %v614_v3, %v1664_v7 }
0x111c   :  { %v1342_v6 = vmul.f32 -1.442695, %v616_v5 }
0x1125   :  { %v861_v53 = vpop.f32.mrf.mxu1 }
0x1126   :  { %v865_v54 = vrot.slane %v861_v53, 4  ;;  %v639_v53 = vrot.slane %v1793_v35, 6 }
0x1128   :  { %v867_v13 = vadd.f32 %v865_v54, %v1751_v56 }
0x112a   :  { %v1358_v55 = vmul.f32 -1.442695, %v867_v13 }
0x112c   :  { %1449 = vpow2.f32 %v1358_v55 }
0x1132   :  { %v1450_v57 = vpop.eup %1449 }
0x1133   :  { %v872_v58 = vadd.f32 1.0, %v1450_v57 }
0x1135   :  { %1451 = vrcp.f32 %v872_v58  ;;  %v884_v43 = vand.u32 2147483648, %v872_v58  ;;  %v882_v45 = vand.u32 2147483647, %v872_v58  ;;  %vm878_vm6 = vweird.f32 %v872_v58 }
0x1136   :  { %1453 = vtanh.f32 %v867_v13 }
0x1137   :  { %v885_v62 = vor.u32 1.1754944e-38, %v884_v43  ;;  %vm883_vm9 = vcmp.eq.f32.partialorder %v882_v45, 8.507059e+37  ;;  %1455 = vpow2.f32 %v1342_v6 }
0x113b   :  { %v1452_v37 = vpop.eup %1451 }
0x113c   :  { %v874_v59 = vmul.f32 %v1452_v37, %v872_v58  ;;  %vm879_vm5 = vweird.f32 %v1452_v37  ;;  %v1454_v0 = vpop.eup %1453 }
0x113d   :  { %vm880_vm7 = vmor %vm878_vm6, %vm879_vm5  ;;  %v1456_v8 = vpop.eup %1455 }
0x113e   :  { %v875_v41 = vsub.f32 1.0, %v874_v59  ;;  %v621_v11 = vadd.f32 1.0, %v1456_v8 }
0x1140   :  { %v876_v60 = vmul.f32 %v1452_v37, %v875_v41  ;;  %1457 = vrcp.f32 %v621_v11  ;;  %v633_v20 = vand.u32 2147483648, %v621_v11  ;;  %vm627_vm11 = vweird.f32 %v621_v11 }
0x1141   :  { %v631_v21 = vand.u32 2147483647, %v621_v11  ;;  %1459 = vtanh.f32 %v616_v5 }
0x1142   :  { %v877_v61 = vadd.f32 %v1452_v37, %v876_v60  ;;  %v634_v22 = vor.u32 1.1754944e-38, %v633_v20 }
0x1143   :  { %vm632_vm15 = vcmp.eq.f32.partialorder %v631_v21, 8.507059e+37 }
0x1144   :  { %v881_v63 = vsel %vm880_vm7, %v1452_v37, %v877_v61 }
0x1145   :  { %v886_v1 = vsel %vm883_vm9, %v885_v62, %v881_v63 }
0x1146   :  { %v888_v2 = vsel %vm1617_vm4, %v1454_v0, %v886_v1  ;;  %v1458_v12 = vpop.eup %1457 }
0x1147   :  { %894 = vrot.lane.b32.xlu0 %v888_v2, %s1536_s21  ;;  %v623_v14 = vmul.f32 %v1458_v12, %v621_v11  ;;  %vm628_vm10 = vweird.f32 %v1458_v12  ;;  %v1460_v23 = vpop.eup %1459  ;;  %v892_v27 = vmul.f32 %v890_v25, %v888_v2 }
0x1148   :  { %vm629_vm8 = vmor %vm627_vm11, %vm628_vm10 }
0x1149   :  { %v624_v15 = vsub.f32 1.0, %v623_v14 }
0x114b   :  { %v625_v16 = vmul.f32 %v1458_v12, %v624_v15 }
0x114d   :  { %v626_v18 = vadd.f32 %v1458_v12, %v625_v16 }
0x114f   :  { %v630_v7 = vsel %vm629_vm8, %v1458_v12, %v626_v18 }
0x1150   :  { %v635_v10 = vsel %vm632_vm15, %v634_v22, %v630_v7 }
0x1151   :  { %v1821_v24 = vsel %vm1617_vm4, %v1460_v23, %v635_v10 }
0x1152   :  { %v641_v57 = vmul.f32 %v639_v53, %v1821_v24 }
0x11b9   :  { %v895_v17 = vpop.permute.xlu0 %894 }
0x11ba   :  { %v897_v19 = vmul.f32 %v895_v17, %v888_v2 }
0x11bc   :  { %899 = vrot.lane.b32.xlu1 %v897_v19, %s1537_s22 }
0x11c4   :  { %643 = vrot.lane.b32.xlu1 %v1821_v24, %s1536_s21 }
0x122e   :  { %v900_v28 = vpop.permute.xlu1 %899 }
0x122f   :  { %v902_v29 = vadd.f32 %v900_v28, %v892_v27 }
0x1231   :  { %1461 = vtanh.f32 %v902_v29  ;;  %v961_v0 = vrot.slane %v902_v29, 6 }
0x1236   :  { %v644_v38 = vpop.permute.xlu1 %643 }
0x1237   :  { %v1462_v30 = vpop.eup %1461  ;;  %v646_v39 = vmul.f32 %v644_v38, %v1821_v24 }
0x1238   :  { %905 = vrot.lane.b32.xlu2 %v1462_v30, %s1536_s21 }
0x1292   :  { %v906_v31 = vpop.permute.xlu2 %905 }
0x1293   :  { %v908_v32 = vmul.f32 %v906_v31, %v888_v2 }
0x1295   :  { %v910_v36 = vrot.slane %v908_v32, 4 }
0x1297   :  { %911 = vrot.lane.b32.xlu0 %v910_v36, %s1537_s22 }
0x129f   :  { %648 = vrot.lane.b32.xlu0 %v646_v39, %s1537_s22 }
0x1309   :  { %v912_v40 = vpop.permute.xlu0 %911 }
0x130a   :  { %1359 = vmatmul.msk.f32.vlgmr.msrb.gmra.mxu3 %vm42_vm0, %v912_v40 }
0x1311   :  { %v649_v55 = vpop.permute.xlu0 %648 }
0x1312   :  { %v651_v37 = vadd.f32 %v649_v55, %v641_v57 }
0x138d   :  { %v932_v42 = vpop.f32.mrf.mxu3 }
0x138e   :  { %v936_v44 = vrot.slane %v932_v42, 2 }
0x1390   :  { %v938_v34 = vadd.f32 %v936_v44, %v1751_v56 }
0x1392   :  { %v1360_v47 = vmul.f32 -1.442695, %v938_v34 }
0x1394   :  { %1463 = vpow2.f32 %v1360_v47 }
0x139a   :  { %v1464_v48 = vpop.eup %1463 }
0x139b   :  { %v943_v49 = vadd.f32 1.0, %v1464_v48 }
0x139d   :  { %1465 = vrcp.f32 %v943_v49  ;;  %v955_v52 = vand.u32 2147483648, %v943_v49  ;;  %v953_v13 = vand.u32 2147483647, %v943_v49  ;;  %vm949_vm2 = vweird.f32 %v943_v49 }
0x139e   :  { %1467 = vtanh.f32 %v938_v34 }
0x139f   :  { %v956_v56 = vor.u32 1.1754944e-38, %v955_v52  ;;  %vm954_vm5 = vcmp.eq.f32.partialorder %v953_v13, 8.507059e+37  ;;  %1469 = vtanh.f32 %v651_v37 }
0x13a3   :  { %v1466_v50 = vpop.eup %1465 }
0x13a4   :  { %v945_v4 = vmul.f32 %v1466_v50, %v943_v49  ;;  %vm950_vm1 = vweird.f32 %v1466_v50  ;;  %v1468_v41 = vpop.eup %1467 }
0x13a5   :  { %vm951_vm3 = vmor %vm949_vm2, %vm950_vm1  ;;  %v1470_v35 = vpop.eup %1469 }
0x13a6   :  { %v946_v51 = vsub.f32 1.0, %v945_v4 }
0x13a8   :  { %v947_v54 = vmul.f32 %v1466_v50, %v946_v51 }
0x13aa   :  { %v948_v58 = vadd.f32 %v1466_v50, %v947_v54 }
0x13ac   :  { %v952_v59 = vsel %vm951_vm3, %v1466_v50, %v948_v58 }
0x13ad   :  { %v957_v43 = vsel %vm954_vm5, %v956_v56, %v952_v59 }
0x13ae   :  { %v959_v60 = vsel %vm1617_vm4, %v1468_v41, %v957_v43 }
0x13af   :  { %965 = vrot.lane.b32.xlu2 %v959_v60, %s1536_s21  ;;  %v963_v1 = vmul.f32 %v961_v0, %v959_v60 }
0x13b7   :  { %654 = vrot.lane.b32.xlu2 %v1470_v35, %s1536_s21 }
0x13bf   :  { %584 = vrot.lane.b32.xlu2 %v1802_v46, %s1537_s22 }
0x1409   :  { %v966_v45 = vpop.permute.xlu2 %965 }
0x140a   :  { %v968_v61 = vmul.f32 %v966_v45, %v959_v60 }
0x140c   :  { %970 = vrot.lane.b32.xlu1 %v968_v61, %s1537_s22 }
0x1411   :  { %v655_v62 = vpop.permute.xlu2 %654 }
0x1412   :  { %v657_v46 = vmul.f32 %v655_v62, %v1821_v24 }
0x1414   :  { %509 = vrot.lane.b32.xlu1 %v1771_v33, %s1537_s22 }
0x1419   :  { %v585_v63 = vpop.permute.xlu2 %584 }
0x141a   :  { %587 = vst.msk [vmem:[#allocation2 + $0x8] sm:$0x30] %vm291_vm13, %v585_v63 }
0x147e   :  { %v971_v2 = vpop.permute.xlu1 %970 }
0x147f   :  { %v973_v3 = vadd.f32 %v971_v2, %v963_v1 }
0x1481   :  { %1471 = vtanh.f32 %v973_v3  ;;  %v1029_v39 = vrot.slane %v973_v3, 6 }
0x1486   :  { %v510_v5 = vpop.permute.xlu1 %509 }
0x1487   :  { %v1472_v6 = vpop.eup %1471  ;;  %512 = vst.msk [vmem:[#allocation2 + $0x8] sm:$0xc] %vm215_vm12, %v510_v5 }
0x1488   :  { %976 = vrot.lane.b32.xlu0 %v1472_v6, %s1536_s21 }
0x1490   :  { %659 = vrot.lane.b32.xlu0 %v657_v46, %s1537_s22 }
0x14fa   :  { %v977_v8 = vpop.permute.xlu0 %976 }
0x14fb   :  { %v979_v33 = vmul.f32 %v977_v8, %v959_v60 }
0x14fd   :  { %v981_v11 = vrot.slane %v979_v33, 6 }
0x14ff   :  { %982 = vrot.lane.b32.xlu1 %v981_v11, %s1537_s22 }
0x1502   :  { %v660_v12 = vpop.permute.xlu0 %659 }
0x1503   :  { %662 = vst.msk [vmem:[#allocation2 + $0x8] sm:$0xc0] %vm367_vm14, %v660_v12 }
0x150a   :  { %v664_v14 = vld [vmem:[#allocation2 + $0x8] sm:$0xff] }
0x150b   :  { %1349 = vmatmul.msk.f32.gmra.mxu2 %vm42_vm0, %v664_v14 }
0x1571   :  { %v983_v15 = vpop.permute.xlu1 %982 }
0x1572   :  { %1361 = vmatmul.msk.f32.vlgmr.msrb.gmra.mxu0 %vm42_vm0, %v983_v15 }
0x158e   :  { %v701_v16 = vpop.f32.mrf.mxu2 }
0x158f   :  { %v1853_v17 = vadd.f32 %v1748_v9, %v701_v16 }
0x15ef   :  { %v1003_v18 = vpop.f32.mrf.mxu0 }
0x15f0   :  { %v1006_v19 = vadd.f32 %v1003_v18, %v1853_v17 }
0x15f2   :  { %v1362_v20 = vmul.f32 -1.442695, %v1006_v19 }
0x15f4   :  { %1473 = vpow2.f32 %v1362_v20 }
0x15fa   :  { %v1474_v21 = vpop.eup %1473 }
0x15fb   :  { %v1011_v7 = vadd.f32 1.0, %v1474_v21 }
0x15fd   :  { %1475 = vrcp.f32 %v1011_v7  ;;  %v1023_v24 = vand.u32 2147483648, %v1011_v7  ;;  %v1021_v27 = vand.u32 2147483647, %v1011_v7  ;;  %vm1017_vm13 = vweird.f32 %v1011_v7 }
0x15fe   :  { %1477 = vtanh.f32 %v1006_v19 }
0x15ff   :  { %v1024_v9 = vor.u32 1.1754944e-38, %v1023_v24  ;;  %vm1022_vm6 = vcmp.eq.f32.partialorder %v1021_v27, 8.507059e+37 }
0x1603   :  { %v1476_v22 = vpop.eup %1475 }
0x1604   :  { %v1013_v10 = vmul.f32 %v1476_v22, %v1011_v7  ;;  %vm1018_vm12 = vweird.f32 %v1476_v22  ;;  %v1478_v30 = vpop.eup %1477 }
0x1605   :  { %vm1019_vm14 = vmor %vm1017_vm13, %vm1018_vm12 }
0x1606   :  { %v1014_v23 = vsub.f32 1.0, %v1013_v10 }
0x1608   :  { %v1015_v25 = vmul.f32 %v1476_v22, %v1014_v23 }
0x160a   :  { %v1016_v28 = vadd.f32 %v1476_v22, %v1015_v25 }
0x160c   :  { %v1020_v29 = vsel %vm1019_vm14, %v1476_v22, %v1016_v28 }
0x160d   :  { %v1025_v31 = vsel %vm1022_vm6, %v1024_v9, %v1020_v29 }
0x160e   :  { %v1027_v32 = vsel %vm1617_vm4, %v1478_v30, %v1025_v31 }
0x160f   :  { %1033 = vrot.lane.b32.xlu2 %v1027_v32, %s1536_s21  ;;  %v1031_v40 = vmul.f32 %v1029_v39, %v1027_v32 }
0x1669   :  { %v1034_v36 = vpop.permute.xlu2 %1033 }
0x166a   :  { %v1036_v38 = vmul.f32 %v1034_v36, %v1027_v32 }
0x166c   :  { %1038 = vrot.lane.b32.xlu0 %v1036_v38, %s1537_s22 }
0x16de   :  { %v1039_v42 = vpop.permute.xlu0 %1038 }
0x16df   :  { %v1041_v44 = vadd.f32 %v1039_v42, %v1031_v40 }
0x16e1   :  { %1479 = vtanh.f32 %v1041_v44  ;;  %v1099_v63 = vrot.slane %v1041_v44, 6 }
0x16e7   :  { %v1480_v34 = vpop.eup %1479 }
0x16e8   :  { %1044 = vrot.lane.b32.xlu1 %v1480_v34, %s1536_s21 }
0x175a   :  { %v1045_v47 = vpop.permute.xlu1 %1044 }
0x175b   :  { %v1047_v48 = vmul.f32 %v1045_v47, %v1027_v32 }
0x175d   :  { %1049 = vrot.lane.b32.xlu2 %v1047_v48, %s1537_s22 }
0x17b7   :  { %v1050_v49 = vpop.permute.xlu2 %1049 }
0x17b8   :  { %1363 = vmatmul.msk.f32.vlgmr.msra.gmra.mxu1 %vm42_vm0, %v1050_v49 }
0x1835   :  { %v1070_v50 = vpop.f32.mrf.mxu1 }
0x1836   :  { %v1074_v4 = vrot.slane %v1070_v50, 6 }
0x1838   :  { %v1076_v51 = vadd.f32 %v1074_v4, %v1853_v17 }
0x183a   :  { %v1364_v52 = vmul.f32 -1.442695, %v1076_v51 }
0x183c   :  { %1481 = vpow2.f32 %v1364_v52 }
0x1842   :  { %v1482_v53 = vpop.eup %1481 }
0x1843   :  { %v1081_v54 = vadd.f32 1.0, %v1482_v53 }
0x1845   :  { %1483 = vrcp.f32 %v1081_v54  ;;  %v1093_v58 = vand.u32 2147483648, %v1081_v54  ;;  %v1091_v37 = vand.u32 2147483647, %v1081_v54  ;;  %vm1087_vm9 = vweird.f32 %v1081_v54 }
0x1846   :  { %1485 = vtanh.f32 %v1076_v51 }
0x1847   :  { %v1094_v41 = vor.u32 1.1754944e-38, %v1093_v58  ;;  %vm1092_vm11 = vcmp.eq.f32.partialorder %v1091_v37, 8.507059e+37 }
0x184b   :  { %v1484_v13 = vpop.eup %1483 }
0x184c   :  { %v1083_v55 = vmul.f32 %v1484_v13, %v1081_v54  ;;  %vm1088_vm7 = vweird.f32 %v1484_v13  ;;  %v1486_v60 = vpop.eup %1485 }
0x184d   :  { %vm1089_vm10 = vmor %vm1087_vm9, %vm1088_vm7 }
0x184e   :  { %v1084_v57 = vsub.f32 1.0, %v1083_v55 }
0x1850   :  { %v1085_v56 = vmul.f32 %v1484_v13, %v1084_v57 }
0x1852   :  { %v1086_v59 = vadd.f32 %v1484_v13, %v1085_v56 }
0x1854   :  { %v1090_v43 = vsel %vm1089_vm10, %v1484_v13, %v1086_v59 }
0x1855   :  { %v1095_v35 = vsel %vm1092_vm11, %v1094_v41, %v1090_v43 }
0x1856   :  { %v1097_v45 = vsel %vm1617_vm4, %v1486_v60, %v1095_v35 }
0x1857   :  { %1103 = vrot.lane.b32.xlu0 %v1097_v45, %s1536_s21  ;;  %v1101_v0 = vmul.f32 %v1099_v63, %v1097_v45  ;;  %v1263_v63 = vld [vmem:[%s1915_s4 + $0x18] sm:$0xff] }
0x1858   :  { %1286 = vmatpush.msra.mxu0 %v1263_v63 }
0x185a   :  { %1287 = vmatpush.msra.mxu0 %v1262_v26 }
0x18c9   :  { %v1104_v61 = vpop.permute.xlu0 %1103 }
0x18ca   :  { %v1106_v62 = vmul.f32 %v1104_v61, %v1097_v45 }
0x18cc   :  { %1108 = vrot.lane.b32.xlu1 %v1106_v62, %s1537_s22 }
0x193e   :  { %v1109_v1 = vpop.permute.xlu1 %1108 }
0x193f   :  { %v1111_v2 = vadd.f32 %v1109_v1, %v1101_v0  ;;  %v1261_v0 = vld [vmem:[%s1915_s4 + $0x8] sm:$0xff]  ;;  %v1260_v1 = vld [vmem:[%s1915_s4] sm:$0xff]  ;;  %s1538_s4 = smov [#allocation3]  }
0x1940   :  { %1288 = vmatpush.msra.mxu0 %v1261_v0 }
0x1941   :  { %1487 = vtanh.f32 %v1111_v2  ;;  %v1170_v30 = vrot.slane %v1111_v2, 6 }
0x1942   :  { %1289 = vmatpush.msra.mxu0 %v1260_v1 }
0x1947   :  { %v1488_v3 = vpop.eup %1487 }
0x1948   :  { %1114 = vrot.lane.b32.xlu2 %v1488_v3, %s1536_s21 }
0x19a2   :  { %v1115_v5 = vpop.permute.xlu2 %1114 }
0x19a3   :  { %v1117_v6 = vmul.f32 %v1115_v5, %v1097_v45 }
0x19a5   :  { %v1119_v46 = vrot.slane %v1117_v6, 2 }
0x19a7   :  { %1120 = vrot.lane.b32.xlu0 %v1119_v46, %s1537_s22  ;;  %v1376_v46 = vld [vmem:[%s1916_s5] ss:$0 sm:$0xff]  ;;  %s1315_s5 = sshll.u32 %s1538_s4, 4  ;;  %s1316_s5 = int_to_ptr.vmem [resolvable:$true] %s1315_s5 }
0x1a19   :  { %v1121_v8 = vpop.permute.xlu0 %1120 }
0x1a1a   :  { %1365 = vmatmul.msk.f32.vlgmr.msrb.gmra.mxu2 %vm42_vm0, %v1121_v8 }
0x1a9d   :  { %v1141_v33 = vpop.f32.mrf.mxu2 }
0x1a9e   :  { %v1145_v11 = vrot.slane %v1141_v33, 4  ;;  %v1294_v33 = vld [vmem:[%s1917_s6] sm:$0x3] }
0x1aa0   :  { %v1147_v12 = vadd.f32 %v1145_v11, %v1853_v17 }
0x1aa2   :  { %v1366_v14 = vmul.f32 -1.442695, %v1147_v12 }
0x1aa4   :  { %1489 = vpow2.f32 %v1366_v14 }
0x1aaa   :  { %v1490_v15 = vpop.eup %1489 }
0x1aab   :  { %v1152_v16 = vadd.f32 1.0, %v1490_v15 }
0x1aad   :  { %1491 = vrcp.f32 %v1152_v16  ;;  %v1164_v21 = vand.u32 2147483648, %v1152_v16  ;;  %v1162_v22 = vand.u32 2147483647, %v1152_v16  ;;  %vm1158_vm15 = vweird.f32 %v1152_v16 }
0x1aae   :  { %1493 = vtanh.f32 %v1147_v12 }
0x1aaf   :  { %v1165_v23 = vor.u32 1.1754944e-38, %v1164_v21  ;;  %vm1163_vm2 = vcmp.eq.f32.partialorder %v1162_v22, 8.507059e+37 }
0x1ab3   :  { %v1492_v18 = vpop.eup %1491 }
0x1ab4   :  { %v1154_v19 = vmul.f32 %v1492_v18, %v1152_v16  ;;  %vm1159_vm8 = vweird.f32 %v1492_v18  ;;  %v1494_v25 = vpop.eup %1493 }
0x1ab5   :  { %vm1160_vm1 = vmor %vm1158_vm15, %vm1159_vm8 }
0x1ab6   :  { %v1155_v20 = vsub.f32 1.0, %v1154_v19 }
0x1ab8   :  { %v1156_v7 = vmul.f32 %v1492_v18, %v1155_v20 }
0x1aba   :  { %v1157_v10 = vadd.f32 %v1492_v18, %v1156_v7 }
0x1abc   :  { %v1161_v24 = vsel %vm1160_vm1, %v1492_v18, %v1157_v10 }
0x1abd   :  { %v1166_v27 = vsel %vm1163_vm2, %v1165_v23, %v1161_v24 }
0x1abe   :  { %v1168_v28 = vsel %vm1617_vm4, %v1494_v25, %v1166_v27 }
0x1abf   :  { %1174 = vrot.lane.b32.xlu1 %v1168_v28, %s1536_s21  ;;  %v1172_v31 = vmul.f32 %v1170_v30, %v1168_v28 }
0x1b31   :  { %v1175_v9 = vpop.permute.xlu1 %1174 }
0x1b32   :  { %v1177_v29 = vmul.f32 %v1175_v9, %v1168_v28 }
0x1b34   :  { %1179 = vrot.lane.b32.xlu2 %v1177_v29, %s1537_s22 }
0x1b8e   :  { %v1180_v32 = vpop.permute.xlu2 %1179 }
0x1b8f   :  { %v1182_v36 = vadd.f32 %v1180_v32, %v1172_v31 }
0x1b91   :  { %1495 = vtanh.f32 %v1182_v36  ;;  %v1241_v60 = vrot.slane %v1182_v36, 6 }
0x1b97   :  { %v1496_v38 = vpop.eup %1495 }
0x1b98   :  { %1185 = vrot.lane.b32.xlu0 %v1496_v38, %s1536_s21 }
0x1c0a   :  { %v1186_v39 = vpop.permute.xlu0 %1185 }
0x1c0b   :  { %v1188_v40 = vmul.f32 %v1186_v39, %v1168_v28 }
0x1c0d   :  { %v1190_v42 = vrot.slane %v1188_v40, 4 }
0x1c0f   :  { %1191 = vrot.lane.b32.xlu1 %v1190_v42, %s1537_s22 }
0x1c81   :  { %v1192_v44 = vpop.permute.xlu1 %1191 }
0x1c82   :  { %1367 = vmatmul.msk.f32.vlgmr.msra.gmra.mxu3 %vm42_vm0, %v1192_v44 }
0x1d05   :  { %v1212_v34 = vpop.f32.mrf.mxu3 }
0x1d06   :  { %v1216_v47 = vrot.slane %v1212_v34, 2 }
0x1d08   :  { %v1218_v48 = vadd.f32 %v1216_v47, %v1853_v17 }
0x1d0a   :  { %v1368_v49 = vmul.f32 -1.442695, %v1218_v48 }
0x1d0c   :  { %1497 = vpow2.f32 %v1368_v49 }
0x1d12   :  { %v1498_v50 = vpop.eup %1497 }
0x1d13   :  { %v1223_v4 = vadd.f32 1.0, %v1498_v50 }
0x1d15   :  { %1499 = vrcp.f32 %v1223_v4  ;;  %v1235_v54 = vand.u32 2147483648, %v1223_v4  ;;  %v1233_v55 = vand.u32 2147483647, %v1223_v4  ;;  %vm1229_vm5 = vweird.f32 %v1223_v4 }
0x1d16   :  { %1501 = vtanh.f32 %v1218_v48 }
0x1d17   :  { %v1236_v58 = vor.u32 1.1754944e-38, %v1235_v54  ;;  %vm1234_vm13 = vcmp.eq.f32.partialorder %v1233_v55, 8.507059e+37 }
0x1d1b   :  { %v1500_v51 = vpop.eup %1499 }
0x1d1c   :  { %v1225_v52 = vmul.f32 %v1500_v51, %v1223_v4  ;;  %vm1230_vm3 = vweird.f32 %v1500_v51  ;;  %v1502_v17 = vpop.eup %1501 }
0x1d1d   :  { %vm1231_vm12 = vmor %vm1229_vm5, %vm1230_vm3 }
0x1d1e   :  { %v1226_v53 = vsub.f32 1.0, %v1225_v52 }
0x1d20   :  { %v1227_v13 = vmul.f32 %v1500_v51, %v1226_v53 }
0x1d22   :  { %v1228_v57 = vadd.f32 %v1500_v51, %v1227_v13 }
0x1d24   :  { %v1232_v56 = vsel %vm1231_vm12, %v1500_v51, %v1228_v57 }
0x1d25   :  { %v1237_v37 = vsel %vm1234_vm13, %v1236_v58, %v1232_v56 }
0x1d26   :  { %v1239_v59 = vsel %vm1617_vm4, %v1502_v17, %v1237_v37  ;;  %vm1296_vm4 = vcmask 58368  }
0x1d27   :  { %1245 = vrot.lane.b32.xlu2 %v1239_v59, %s1536_s21  ;;  %v1243_v35 = vmul.f32 %v1241_v60, %v1239_v59 }
0x1d81   :  { %v1246_v41 = vpop.permute.xlu2 %1245 }
0x1d82   :  { %v1248_v43 = vmul.f32 %v1246_v41, %v1239_v59 }
0x1d84   :  { %1250 = vrot.lane.b32.xlu0 %v1248_v43, %s1537_s22 }
0x1df6   :  { %v1251_v45 = vpop.permute.xlu0 %1250 }
0x1df7   :  { %v1253_v61 = vadd.f32 %v1251_v45, %v1243_v35 }
0x1df9   :  { %1503 = vtanh.f32 %v1253_v61 }
0x1dff   :  { %v1504_v62 = vpop.eup %1503 }
0x1e00   :  { %1256 = vrot.lane.b32.xlu1 %v1504_v62, %s1536_s21 }
0x1e72   :  { %v1257_v2 = vpop.permute.xlu1 %1256 }
0x1e73   :  { %v1259_v3 = vmul.f32 %v1257_v2, %v1239_v59 }
0x1e75   :  { %v1269_v5 = vrot.slane %v1259_v3, 6 }
0x1e77   :  { %1270 = vrot.lane.b32.xlu2 %v1269_v5, %s1537_s22 }
0x1ed1   :  { %v1271_v6 = vpop.permute.xlu2 %1270 }
0x1ed2   :  { %1369 = vmatmul.msk.f32.vlgmr.msra.gmra.mxu0 %vm42_vm0, %v1271_v6 }
0x1f4f   :  { %v1291_v8 = vpop.f32.mrf.mxu0 }
0x1f50   :  { %v1292_v11 = vadd.f32 %v1376_v46, %v1291_v8 }
0x1f52   :  { %v1295_v12 = vmul.f32 %v1294_v33, %v1292_v11 }
0x1f54   :  { %v1297_v14 = vsel %vm1296_vm4, %v1295_v12, -inf }
0x1f55   :  { %1298 = vmax.xlane.f32.xlu0 %v1297_v14 }
0x1fc8   :  { %v1299_v15 = vpop.xlane.xlu0 %1298 }
0x1fc9   :  { %v1300_v16 = vsub.f32 %v1295_v12, %v1299_v15 }
0x1fcb   :  { %v1301_v18 = vmul.f32 1.442695, %v1300_v16 }
0x1fcd   :  { %1505 = vpow2.f32 %v1301_v18 }
0x1fd3   :  { %v1506_v19 = vpop.eup %1505 }
0x1fd4   :  { %v1303_v20 = vsel %vm1296_vm4, %v1506_v19, 0.0 }
0x1fd5   :  { %1304 = vadd.xlane.f32.xlu1 %v1303_v20 }
0x2048   :  { %v1305_v21 = vpop.xlane.xlu1 %1304 }
0x2049   :  { %1507 = vlog2.f32 %v1305_v21 }
0x204f   :  { %v1508_v7 = vpop.eup %1507 }
0x2050   :  { %v1307_v22 = vmul.f32 0.6931472, %v1508_v7 }
0x2052   :  { %v1308_v10 = vsub.f32 %v1300_v16, %v1307_v22 }
0x2054   :  { %1309 = vst.msk [vmem:[#allocation3] sm:$0x3] %vm1296_vm4, %v1308_v10 }
0x2055   :  { %1320 = dma.vmem_to_hbm [thread:$0]  %s1316_s5, 32, %s1318_s28, [#allocation4]  }
0x2056   :  { %1533 = dma.done.wait [#allocation4], 32  }
0x2057   :  { %1534 = vsyncadd [#allocation4], 4294967264 }
0x2058   :  { %1325 = vsyncpa [#allocation4], 1 }

</bundles_post_ra>
